<compile_context>
chip_gen: v7x
topology: tpu7x:2x2x1
jax: 0.10.0
libtpu: 0.0.40
codegen_flags: <defaults>
</compile_context>

<pallas_src>
import math

import jax
import jax.numpy as jnp
from jax.experimental import pallas as pl
from jax.experimental.pallas import tpu as pltpu

_MXU_DTYPE = jnp.bfloat16          # matmul operand / activation-intermediate dtype
_PROBS_DTYPE = jnp.float32         # returned attention maps stay f32 for fidelity
_ROW_TILE = 512                    # M-axis tile for row-wise kernels
_ATTN_Q_TILE = 256                 # query-row tile for the attention core
_LN_EPS = 1e-12                    # nn.LayerNorm eps used by this module
_SQRT1_2 = 1.0 / math.sqrt(2.0)

# Filled in eagerly from __main__ (never under jit tracing).
_single_buffer_ok = False
_vmem_limit_cache = None


# ----------------------------- capability / config -----------------------------

def _probe_single_buffering():
    """Eagerly check whether BlockSpec(pipeline_mode=pl.Buffered(1)) works here."""
    global _single_buffer_ok
    try:
        def _copy(x_ref, o_ref):
            o_ref[...] = x_ref[...]
        f = pl.pallas_call(
            _copy,
            out_shape=jax.ShapeDtypeStruct((16, 128), jnp.float32),
            grid=(2,),
            in_specs=[pl.BlockSpec((8, 128), lambda i: (0, 0),
                                   pipeline_mode=pl.Buffered(1))],
            out_specs=pl.BlockSpec((8, 128), lambda i: (i, 0)),
        )
        jax.block_until_ready(f(jnp.zeros((8, 128), jnp.float32)))
        _single_buffer_ok = True
    except Exception:
        _single_buffer_ok = False
    return _single_buffer_ok


def _vmem_limit_bytes():
    """Generation-dependent VMEM cap: ~3/4 of physical (48 MiB v7x, 96 MiB v5e/v6e)."""
    global _vmem_limit_cache
    if _vmem_limit_cache is None:
        limit = 48 * 1024 * 1024
        try:
            info = pltpu.get_tpu_info()
            cap = None
            for name in ("vmem_capacity_bytes", "vmem_size_bytes", "vmem_bytes"):
                cap = getattr(info, name, None)
                if cap:
                    break
            if cap:
                limit = min((int(cap) * 3) // 4, 100 * 1024 * 1024)
        except Exception:
            pass
        _vmem_limit_cache = limit
    return _vmem_limit_cache


def _compiler_params(n_grid_dims=1):
    return pltpu.CompilerParams(
        dimension_semantics=("parallel",) * n_grid_dims,
        vmem_limit_bytes=_vmem_limit_bytes())


def _const_spec(block_shape):
    """BlockSpec for a grid-invariant operand (weights / biases / LN params).

    Single-buffered when supported: these blocks never change across the grid,
    so the default double-buffering only doubles their VMEM footprint.
    """
    ndim = len(block_shape)
    index_map = lambda *_: (0,) * ndim
    if _single_buffer_ok:
        return pl.BlockSpec(block_shape, index_map, pipeline_mode=pl.Buffered(1))
    return pl.BlockSpec(block_shape, index_map)


def _row_tile(m):
    return m if m <= _ROW_TILE else _ROW_TILE


def _q_tile(sq):
    if sq <= _ATTN_Q_TILE:
        return sq
    for t in (_ATTN_Q_TILE, 128, 64, 32, 16, 8):
        if sq % t == 0:
            return t
    return sq


# ----------------------------- elementwise helpers -----------------------------

def _erf_approx(x):
    # Abramowitz & Stegun 7.1.26, |abs err| < 1.5e-7 — f32-accurate erf for GELU.
    a1, a2, a3, a4, a5 = 0.254829592, -0.284496736, 1.421413741, -1.453152027, 1.061405429
    p = 0.3275911
    sgn = jnp.where(x >= 0.0, 1.0, -1.0)
    ax = jnp.abs(x)
    t = 1.0 / (1.0 + p * ax)
    poly = ((((a5 * t + a4) * t + a3) * t + a2) * t + a1) * t
    return sgn * (1.0 - poly * jnp.exp(-ax * ax))


def _gelu_exact(x):
    # F.gelu default ("none") = exact erf GELU, kept in f32.
    return 0.5 * x * (1.0 + _erf_approx(x * _SQRT1_2))


def _layernorm(z, gamma, beta, eps):
    mean = jnp.mean(z, axis=-1, keepdims=True)
    zc = z - mean
    var = jnp.mean(zc * zc, axis=-1, keepdims=True)   # biased var (torch LayerNorm)
    return zc * jax.lax.rsqrt(var + eps) * gamma + beta


# ----------------------------- Pallas kernels -----------------------------

def _make_proj_kernel(n_out, n_each):
    """y = x @ W + b, split along the output dim into n_out refs (fused QKV/KV/Q)."""
    def kernel(x_ref, w_ref, b_ref, *o_refs):
        y = jnp.dot(x_ref[...].astype(w_ref.dtype), w_ref[...],
                    preferred_element_type=jnp.float32) + b_ref[...]
        for idx in range(n_out):
            o_refs[idx][...] = y[:, idx * n_each:(idx + 1) * n_each].astype(o_refs[idx].dtype)
    return kernel


def fused_proj_pallas(x, w, b, n_out):
    M, K = x.shape
    N = w.shape[1]
    n_each = N // n_out
    TM = _row_tile(M)
    grid = (pl.cdiv(M, TM),)
    in_specs = [
        pl.BlockSpec((TM, K), lambda i: (i, 0)),
        _const_spec((K, N)),         # bf16 weights, VMEM-resident, single-buffered
        _const_spec((1, N)),         # f32 bias
    ]
    if n_out == 1:
        out_shape = jax.ShapeDtypeStruct((M, n_each), _MXU_DTYPE)
        out_specs = pl.BlockSpec((TM, n_each), lambda i: (i, 0))
    else:
        out_shape = tuple(jax.ShapeDtypeStruct((M, n_each), _MXU_DTYPE)
                          for _ in range(n_out))
        out_specs = tuple(pl.BlockSpec((TM, n_each), lambda i: (i, 0))
                          for _ in range(n_out))
    res = pl.pallas_call(
        _make_proj_kernel(n_out, n_each),
        out_shape=out_shape,
        grid=grid,
        in_specs=in_specs,
        out_specs=out_specs,
        compiler_params=_compiler_params(1),
    )(x, w, b)
    return (res,) if n_out == 1 else tuple(res)


def _make_outproj_add_ln_kernel(eps):
    """out = LayerNorm(residual + (ctx @ Wo + bo))  — fused dense + add + LN."""
    def kernel(ctx_ref, res_ref, w_ref, b_ref, g_ref, bb_ref, o_ref):
        y = jnp.dot(ctx_ref[...].astype(w_ref.dtype), w_ref[...],
                    preferred_element_type=jnp.float32) + b_ref[...]
        o_ref[...] = _layernorm(res_ref[...] + y, g_ref[...], bb_ref[...], eps)
    return kernel


def outproj_add_ln_pallas(ctx, residual, w, b, gamma, beta, eps=_LN_EPS):
    M, D = ctx.shape
    N = w.shape[1]
    TM = _row_tile(M)
    return pl.pallas_call(
        _make_outproj_add_ln_kernel(eps),
        out_shape=jax.ShapeDtypeStruct((M, N), jnp.float32),
        grid=(pl.cdiv(M, TM),),
        in_specs=[
            pl.BlockSpec((TM, D), lambda i: (i, 0)),   # ctx (bf16)
            pl.BlockSpec((TM, N), lambda i: (i, 0)),   # residual (f32)
            _const_spec((D, N)),
            _const_spec((1, N)),
            _const_spec((1, N)),
            _const_spec((1, N)),
        ],
        out_specs=pl.BlockSpec((TM, N), lambda i: (i, 0)),
        compiler_params=_compiler_params(1),
    )(ctx, residual, w, b, gamma, beta)


def _make_ffn_add_ln_kernel(eps):
    """out = LayerNorm(x + W2 @ gelu(W1 @ x + b1) + b2)  — fused FFN + add + LN."""
    def kernel(x_ref, w1_ref, b1_ref, w2_ref, b2_ref, g_ref, bb_ref, o_ref):
        x = x_ref[...]                                          # f32 residual
        h = jnp.dot(x.astype(w1_ref.dtype), w1_ref[...],
                    preferred_element_type=jnp.float32) + b1_ref[...]
        h = _gelu_exact(h)                                      # f32 elementwise
        y = jnp.dot(h.astype(w2_ref.dtype), w2_ref[...],
                    preferred_element_type=jnp.float32) + b2_ref[...]
        o_ref[...] = _layernorm(x + y, g_ref[...], bb_ref[...], eps)
    return kernel


def ffn_add_ln_pallas(x, w1, b1, w2, b2, gamma, beta, eps=_LN_EPS):
    M, D = x.shape
    F = w1.shape[1]
    TM = _row_tile(M)
    # NOTE: with bf16 weights + single-buffering, W1+W2 fit VMEM up to F~4096 at
    # D=1024; TODO(synk): tile the F axis with a VMEM accumulator for larger F.
    return pl.pallas_call(
        _make_ffn_add_ln_kernel(eps),
        out_shape=jax.ShapeDtypeStruct((M, D), jnp.float32),
        grid=(pl.cdiv(M, TM),),
        in_specs=[
            pl.BlockSpec((TM, D), lambda i: (i, 0)),
            _const_spec((D, F)),
            _const_spec((1, F)),
            _const_spec((F, D)),
            _const_spec((1, D)),
            _const_spec((1, D)),
            _const_spec((1, D)),
        ],
        out_specs=pl.BlockSpec((TM, D), lambda i: (i, 0)),
        compiler_params=_compiler_params(1),
    )(x, w1, b1, w2, b2, gamma, beta)


def _make_attn_kernel(nhead, dh, need_probs, has_mask):
    """Per-(batch, q-tile) attention; all heads per grid step, static head loop.

    The 1/sqrt(dh) scale is already folded into the Q projection weights.
    The key-padding mask is hoisted to a single additive (1, Sk) bias.
    Per-head contexts go into a VMEM scratch; one lane-dense store at the end.
    """
    def body(q_ref, k_ref, v_ref, m_ref, ctx_ref, probs_ref, ctx_scr):
        q = q_ref[0]                      # (TQ, D)  bf16, pre-scaled
        k = k_ref[0]                      # (Sk, D)  bf16
        v = v_ref[0]                      # (Sk, D)  bf16
        if has_mask:
            # torch: attention_scores[mask] = -9e9  (key/column padding);
            # implemented here as an additive bias hoisted out of the head loop.
            bias = jnp.where(m_ref[0] > 0.5, jnp.float32(-9.0e9), jnp.float32(0.0))
        for h in range(nhead):            # static unrolled head loop
            lo, hi = h * dh, (h + 1) * dh
            s = jax.lax.dot_general(q[:, lo:hi], k[:, lo:hi],
                                    (((1,), (1,)), ((), ())),
                                    preferred_element_type=jnp.float32)
            if has_mask:
                s = s + bias
            s_max = jnp.max(s, axis=-1, keepdims=True)
            e = jnp.exp(s - s_max)
            p = e * pl.reciprocal(jnp.sum(e, axis=-1, keepdims=True), approx=True)
            if need_probs:
                probs_ref[0, h] = p.astype(probs_ref.dtype)
            ctx_scr[:, lo:hi] = jnp.dot(p.astype(v.dtype), v[:, lo:hi],
                                        preferred_element_type=jnp.float32)
        ctx_ref[0] = ctx_scr[...].astype(ctx_ref.dtype)   # single lane-dense store

    if has_mask and need_probs:
        def kernel(q, k, v, m, ctx, probs, scr): body(q, k, v, m, ctx, probs, scr)
    elif has_mask:
        def kernel(q, k, v, m, ctx, scr): body(q, k, v, m, ctx, None, scr)
    elif need_probs:
        def kernel(q, k, v, ctx, probs, scr): body(q, k, v, None, ctx, probs, scr)
    else:
        def kernel(q, k, v, ctx, scr): body(q, k, v, None, ctx, None, scr)
    return kernel


def attn_core_pallas(q, k, v, key_mask_b, nhead, dh, need_probs):
    B, Sq, D = q.shape
    Sk = k.shape[1]
    TQ = _q_tile(Sq)
    nq = pl.cdiv(Sq, TQ)
    has_mask = key_mask_b is not None

    in_specs = [
        pl.BlockSpec((1, TQ, D), lambda b, qi: (b, qi, 0)),
        pl.BlockSpec((1, Sk, D), lambda b, qi: (b, 0, 0)),
        pl.BlockSpec((1, Sk, D), lambda b, qi: (b, 0, 0)),
    ]
    inputs = [q, k, v]
    if has_mask:
        in_specs.append(pl.BlockSpec((1, 1, Sk), lambda b, qi: (b, 0, 0)))
        inputs.append(key_mask_b)

    ctx_shape = jax.ShapeDtypeStruct((B, Sq, D), _MXU_DTYPE)
    ctx_spec = pl.BlockSpec((1, TQ, D), lambda b, qi: (b, qi, 0))
    if need_probs:
        out_shape = (ctx_shape,
                     jax.ShapeDtypeStruct((B, nhead, Sq, Sk), _PROBS_DTYPE))
        out_specs = (ctx_spec,
                     pl.BlockSpec((1, nhead, TQ, Sk), lambda b, qi: (b, 0, qi, 0)))
    else:
        out_shape = ctx_shape
        out_specs = ctx_spec

    res = pl.pallas_call(
        _make_attn_kernel(nhead, dh, need_probs, has_mask),
        out_shape=out_shape,
        grid=(B, nq),
        in_specs=in_specs,
        out_specs=out_specs,
        scratch_shapes=[pltpu.VMEM((TQ, D), jnp.float32)],
        compiler_params=_compiler_params(2),
    )(*inputs)
    if need_probs:
        ctx, probs = res
        return ctx, probs
    return res, None


# --------------------------- module composition ---------------------------

def attention_forward(p, nhead, query, kv_input, key_mask, *, self_attn, need_probs):
    """Attention.forward up to (but not including) the output dense; dropout = identity."""
    B, Sq, D = query.shape
    Sk = kv_input.shape[1]
    dh = D // nhead

    q2 = query.reshape(B * Sq, D)
    if self_attn:
        q, k, v = fused_proj_pallas(q2, p['w_qkv'], p['b_qkv'], 3)
    else:
        (q,) = fused_proj_pallas(q2, p['w_q'], p['b_q'], 1)
        kv2 = kv_input.reshape(B * Sk, D)
        k, v = fused_proj_pallas(kv2, p['w_kv'], p['b_kv'], 2)

    q = q.reshape(B, Sq, D)
    k = k.reshape(B, Sk, D)
    v = v.reshape(B, Sk, D)

    mask_b = None if key_mask is None else key_mask.astype(jnp.float32)[:, None, :]

    ctx, probs = attn_core_pallas(q, k, v, mask_b, nhead, dh, need_probs)
    return ctx, probs            # ctx is (B, Sq, D) bf16 with heads concatenated


def encoder_forward(p, nhead, src, src_mask, need_probs):
    B, S, D = src.shape
    a = p['attn']
    ctx, probs = attention_forward(a, nhead, src, src, src_mask,
                                   self_attn=True, need_probs=need_probs)
    x1 = outproj_add_ln_pallas(ctx.reshape(B * S, D), src.reshape(B * S, D),
                               a['w_o'], a['b_o'], p['ln1_g'], p['ln1_b'])
    x2 = ffn_add_ln_pallas(x1, p['w1'], p['b1'], p['w2'], p['b2'],
                           p['ln2_g'], p['ln2_b'])
    return x2.reshape(B, S, D), probs


def decoder_forward(p, nhead, tgt, memory, tgt_key_mask, memory_key_mask, need_probs):
    B, St, D = tgt.shape
    sa = p['self_attn']
    ctx_s, self_probs = attention_forward(sa, nhead, tgt, tgt, tgt_key_mask,
                                          self_attn=True, need_probs=need_probs)
    x1 = outproj_add_ln_pallas(ctx_s.reshape(B * St, D), tgt.reshape(B * St, D),
                               sa['w_o'], sa['b_o'], p['ln1_g'], p['ln1_b'])
    x1_bsd = x1.reshape(B, St, D)

    ca = p['cross_attn']
    ctx_c, cross_probs = attention_forward(ca, nhead, x1_bsd, memory, memory_key_mask,
                                           self_attn=False, need_probs=need_probs)
    x2 = outproj_add_ln_pallas(ctx_c.reshape(B * St, D), x1,
                               ca['w_o'], ca['b_o'], p['ln2_g'], p['ln2_b'])
    x3 = ffn_add_ln_pallas(x2, p['w1'], p['b1'], p['w2'], p['b2'],
                           p['ln3_g'], p['ln3_b'])
    return x3.reshape(B, St, D), self_probs, cross_probs


def transformer_layer_forward(params, nhead, require_attn, src, tgt,
                              src_key_padding_mask=None, tgt_key_padding_mask=None,
                              memory_key_padding_mask=None):
    if tgt is not None:
        enc_out, reactant_self_attn = encoder_forward(
            params['encoder'], nhead, src, src_key_padding_mask, require_attn)
        dec_out, enzyme_self_attn, enzyme_cross_attn = decoder_forward(
            params['decoder'], nhead, tgt, enc_out,
            tgt_key_padding_mask, memory_key_padding_mask, require_attn)
        if require_attn:
            return (enc_out, dec_out, reactant_self_attn,
                    enzyme_self_attn, enzyme_cross_attn)
        return enc_out, dec_out
    else:
        enc_out, product_self_attn = encoder_forward(
            params['encoder'], nhead, src, src_key_padding_mask, require_attn)
        return (enc_out, product_self_attn) if require_attn else enc_out


# ------------------------------ parameters --------------------------------

def _init_linear(key, d_in, d_out, scale=0.05):
    kw, kb = jax.random.split(key)
    # stored as (d_in, d_out), i.e. torch weight transposed
    w = jax.random.normal(kw, (d_in, d_out), jnp.float32) * scale
    b = jax.random.normal(kb, (1, d_out), jnp.float32) * scale
    return w, b


def _init_attention(key, d_model, nhead):
    ks = jax.random.split(key, 4)
    dh = d_model // nhead
    qscale = 1.0 / math.sqrt(dh)
    w, b = {}, {}
    for name, kk in zip(('q', 'k', 'v', 'o'), ks):
        w[name], b[name] = _init_linear(kk, d_model, d_model)
    # Fold the 1/sqrt(dh) attention scale into the Q projection (exact identity:
    # (xWq + bq) * s == x(Wq*s) + bq*s) -> zero per-step cost inside the kernel.
    wq, bq = w['q'] * qscale, b['q'] * qscale
    return {
        # fused, bf16, kernel-ready weight forms (built once at init)
        'w_qkv': jnp.concatenate([wq, w['k'], w['v']], axis=1).astype(_MXU_DTYPE),
        'b_qkv': jnp.concatenate([bq, b['k'], b['v']], axis=1),            # f32
        'w_q': wq.astype(_MXU_DTYPE), 'b_q': bq,
        'w_kv': jnp.concatenate([w['k'], w['v']], axis=1).astype(_MXU_DTYPE),
        'b_kv': jnp.concatenate([b['k'], b['v']], axis=1),
        'w_o': w['o'].astype(_MXU_DTYPE), 'b_o': b['o'],
    }


def init_params(key, d_model, nhead, dim_feedforward):
    ke_root, kd_root = jax.random.split(key)
    ke = jax.random.split(ke_root, 3)
    kd = jax.random.split(kd_root, 4)

    enc = {'attn': _init_attention(ke[0], d_model, nhead)}
    w1, b1 = _init_linear(ke[1], d_model, dim_feedforward)
    w2, b2 = _init_linear(ke[2], dim_feedforward, d_model)
    enc['w1'], enc['b1'] = w1.astype(_MXU_DTYPE), b1
    enc['w2'], enc['b2'] = w2.astype(_MXU_DTYPE), b2
    for n in ('ln1', 'ln2'):
        enc[n + '_g'] = jnp.ones((1, d_model), jnp.float32)
        enc[n + '_b'] = jnp.zeros((1, d_model), jnp.float32)

    dec = {'self_attn': _init_attention(kd[0], d_model, nhead),
           'cross_attn': _init_attention(kd[1], d_model, nhead)}
    w1, b1 = _init_linear(kd[2], d_model, dim_feedforward)
    w2, b2 = _init_linear(kd[3], dim_feedforward, d_model)
    dec['w1'], dec['b1'] = w1.astype(_MXU_DTYPE), b1
    dec['w2'], dec['b2'] = w2.astype(_MXU_DTYPE), b2
    for n in ('ln1', 'ln2', 'ln3'):
        dec[n + '_g'] = jnp.ones((1, d_model), jnp.float32)
        dec[n + '_b'] = jnp.zeros((1, d_model), jnp.float32)

    return {'encoder': enc, 'decoder': dec}


# --------------------------------- main ------------------------------------

if __name__ == "__main__":
    d_model, nhead, dim_feedforward = 32, 4, 64
    B, S_src, S_tgt = 2, 8, 8
    require_attn = True

    # Eager (non-traced) capability / config probes used by the BlockSpec builders.
    _probe_single_buffering()
    _vmem_limit_bytes()

    key = jax.random.PRNGKey(0)
    kp, ks, kt = jax.random.split(key, 3)
    params = init_params(kp, d_model, nhead, dim_feedforward)

    src = jax.random.normal(ks, (B, S_src, d_model), jnp.float32)
    tgt = jax.random.normal(kt, (B, S_tgt, d_model), jnp.float32)

    # key-padding masks (1.0 == padded position => masked out), mirroring the
    # torch module's boolean masks used as `scores[mask] = -9e9`.
    src_key_padding_mask = jnp.zeros((B, S_src), jnp.float32).at[:, -2:].set(1.0)
    tgt_key_padding_mask = jnp.zeros((B, S_tgt), jnp.float32).at[:, -1:].set(1.0)
    memory_key_padding_mask = src_key_padding_mask

    fwd = jax.jit(transformer_layer_forward, static_argnums=(1, 2))
    outs = fwd(params, nhead, require_attn, src, tgt,
               src_key_padding_mask, tgt_key_padding_mask, memory_key_padding_mask)
    outs = jax.block_until_ready(outs)

    enc_out, dec_out, reactant_sa, enzyme_sa, enzyme_ca = outs
    assert enc_out.shape == (B, S_src, d_model)
    assert dec_out.shape == (B, S_tgt, d_model)
    assert reactant_sa.shape == (B, nhead, S_src, S_src)
    assert enzyme_sa.shape == (B, nhead, S_tgt, S_tgt)
    assert enzyme_ca.shape == (B, nhead, S_tgt, S_src)
    assert bool(jnp.isfinite(enc_out).all())
    assert bool(jnp.isfinite(dec_out).all())
    assert bool(jnp.isfinite(reactant_sa).all())
    assert bool(jnp.isfinite(enzyme_sa).all())
    assert bool(jnp.isfinite(enzyme_ca).all())

    print("KERNEL_OK")
</pallas_src>

<mosaic_0001>
module attributes {stable_mosaic.version = 11 : i64} {
  func.func @_copy(%arg0: i32, %arg1: memref<8x128xf32, #tpu.memory_space<vmem>>, %arg2: memref<8x128xf32, #tpu.memory_space<vmem>>) attributes {dimension_semantics = [#tpu.dimension_semantics<arbitrary>], iteration_bounds = array<i64: 2>, scalar_prefetch = 0 : i64, scratch_operands = 0 : i64, tpu.core_type = #tpu.core_type<tc>, window_params = [{pipeline_mode = #tpu.pipeline_mode<synchronous>, transform_indices = @transform_0, window_bounds = array<i64: 8, 128>}, {transform_indices = @transform_1, window_bounds = array<i64: 8, 128>}]} {
    %c0 = arith.constant 0 : index
    %c0_0 = arith.constant 0 : index
    %0 = vector.load %arg1[%c0, %c0_0] : memref<8x128xf32, #tpu.memory_space<vmem>>, vector<8x128xf32>
    %c0_1 = arith.constant 0 : index
    %c0_2 = arith.constant 0 : index
    %1 = vector.load %arg2[%c0_1, %c0_2] : memref<8x128xf32, #tpu.memory_space<vmem>>, vector<8x128xf32>
    tpu.vector_store %arg2[%c0_1, %c0_2], %0 {strides = array<i32>} : memref<8x128xf32, #tpu.memory_space<vmem>>, vector<8x128xf32>,
    return
  }
  func.func @transform_0(%arg0: i32) -> (i32, i32) {
    %c0_i32 = arith.constant 0 : i32
    %c0_i32_0 = arith.constant 0 : i32
    %c0_i32_1 = arith.constant 0 : i32
    return %c0_i32, %c0_i32_0 : i32, i32
  }
  func.func @transform_1(%arg0: i32) -> (i32, i32) {
    %c0_i32 = arith.constant 0 : i32
    %c0_i32_0 = arith.constant 0 : i32
    return %arg0, %c0_i32 : i32, i32
  }
}

module attributes {stable_mosaic.version = 11 : i64} {
  func.func @kernel(%arg0: i32, %arg1: memref<16x32xf32, #tpu.memory_space<vmem>>, %arg2: memref<32x64xbf16, #tpu.memory_space<vmem>>, %arg3: memref<1x64xf32, #tpu.memory_space<vmem>>, %arg4: memref<64x32xbf16, #tpu.memory_space<vmem>>, %arg5: memref<1x32xf32, #tpu.memory_space<vmem>>, %arg6: memref<1x32xf32, #tpu.memory_space<vmem>>, %arg7: memref<1x32xf32, #tpu.memory_space<vmem>>, %arg8: memref<16x32xf32, #tpu.memory_space<vmem>>) attributes {dimension_semantics = [#tpu.dimension_semantics<parallel>], iteration_bounds = array<i64: 1>, scalar_prefetch = 0 : i64, scratch_operands = 0 : i64, tpu.core_type = #tpu.core_type<tc>, window_params = [{transform_indices = @transform_0, window_bounds = array<i64: 16, 32>}, {pipeline_mode = #tpu.pipeline_mode<synchronous>, transform_indices = @transform_1, window_bounds = array<i64: 32, 64>}, {pipeline_mode = #tpu.pipeline_mode<synchronous>, transform_indices = @transform_2, window_bounds = array<i64: 1, 64>}, {pipeline_mode = #tpu.pipeline_mode<synchronous>, transform_indices = @transform_3, window_bounds = array<i64: 64, 32>}, {pipeline_mode = #tpu.pipeline_mode<synchronous>, transform_indices = @transform_4, window_bounds = array<i64: 1, 32>}, {pipeline_mode = #tpu.pipeline_mode<synchronous>, transform_indices = @transform_5, window_bounds = array<i64: 1, 32>}, {pipeline_mode = #tpu.pipeline_mode<synchronous>, transform_indices = @transform_6, window_bounds = array<i64: 1, 32>}, {transform_indices = @transform_7, window_bounds = array<i64: 16, 32>}]} {
    %c0 = arith.constant 0 : index
    %c0_0 = arith.constant 0 : index
    %0 = vector.load %arg1[%c0, %c0_0] : memref<16x32xf32, #tpu.memory_space<vmem>>, vector<16x32xf32>
    %1 = arith.truncf %0 : vector<16x32xf32> to vector<16x32xbf16>
    %c0_1 = arith.constant 0 : index
    %c0_2 = arith.constant 0 : index
    %2 = vector.load %arg2[%c0_1, %c0_2] : memref<32x64xbf16, #tpu.memory_space<vmem>>, vector<32x64xbf16>
    %cst = arith.constant dense<0.000000e+00> : vector<16x64xf32>
    %3 = tpu.matmul %1, %2, %cst {dimension_numbers = #tpu.dot_dimension_numbers<[1], [0], [0], [1], [0, 0, 1, 1], [], []>} : vector<16x32xbf16>, vector<32x64xbf16>, vector<16x64xf32> -> vector<16x64xf32>
    %c0_3 = arith.constant 0 : index
    %c0_4 = arith.constant 0 : index
    %4 = vector.load %arg3[%c0_3, %c0_4] : memref<1x64xf32, #tpu.memory_space<vmem>>, vector<1x64xf32>
    %5 = vector.broadcast %4 : vector<1x64xf32> to vector<16x64xf32>
    %6 = arith.addf %3, %5 : vector<16x64xf32>
    %cst_5 = arith.constant 5.000000e-01 : f32
    %7 = vector.broadcast %cst_5 : f32 to vector<16x64xf32>
    %8 = arith.mulf %7, %6 : vector<16x64xf32>
    %cst_6 = arith.constant 0.707106769 : f32
    %9 = vector.broadcast %cst_6 : f32 to vector<16x64xf32>
    %10 = arith.mulf %6, %9 : vector<16x64xf32>
    %cst_7 = arith.constant 0.000000e+00 : f32
    %11 = vector.broadcast %cst_7 : f32 to vector<16x64xf32>
    %12 = arith.cmpf oge, %10, %11 : vector<16x64xf32>
    %cst_8 = arith.constant 1.000000e+00 : f32
    %cst_9 = arith.constant -1.000000e+00 : f32
    %13 = vector.broadcast %cst_8 : f32 to vector<16x64xf32>
    %14 = vector.broadcast %cst_9 : f32 to vector<16x64xf32>
    %15 = arith.select %12, %13, %14 : vector<16x64xi1>, vector<16x64xf32>
    %16 = math.absf %10 : vector<16x64xf32>
    %cst_10 = arith.constant 0.327591091 : f32
    %17 = vector.broadcast %cst_10 : f32 to vector<16x64xf32>
    %18 = arith.mulf %17, %16 : vector<16x64xf32>
    %cst_11 = arith.constant 1.000000e+00 : f32
    %19 = vector.broadcast %cst_11 : f32 to vector<16x64xf32>
    %20 = arith.addf %19, %18 : vector<16x64xf32>
    %cst_12 = arith.constant 1.000000e+00 : f32
    %21 = vector.broadcast %cst_12 : f32 to vector<16x64xf32>
    %22 = arith.divf %21, %20 : vector<16x64xf32>
    %cst_13 = arith.constant 1.06140542 : f32
    %23 = vector.broadcast %cst_13 : f32 to vector<16x64xf32>
    %24 = arith.mulf %23, %22 : vector<16x64xf32>
    %cst_14 = arith.constant -1.45315206 : f32
    %25 = vector.broadcast %cst_14 : f32 to vector<16x64xf32>
    %26 = arith.addf %24, %25 : vector<16x64xf32>
    %27 = arith.mulf %26, %22 : vector<16x64xf32>
    %cst_15 = arith.constant 1.42141378 : f32
    %28 = vector.broadcast %cst_15 : f32 to vector<16x64xf32>
    %29 = arith.addf %27, %28 : vector<16x64xf32>
    %30 = arith.mulf %29, %22 : vector<16x64xf32>
    %cst_16 = arith.constant -0.284496725 : f32
    %31 = vector.broadcast %cst_16 : f32 to vector<16x64xf32>
    %32 = arith.addf %30, %31 : vector<16x64xf32>
    %33 = arith.mulf %32, %22 : vector<16x64xf32>
    %cst_17 = arith.constant 0.254829586 : f32
    %34 = vector.broadcast %cst_17 : f32 to vector<16x64xf32>
    %35 = arith.addf %33, %34 : vector<16x64xf32>
    %36 = arith.mulf %35, %22 : vector<16x64xf32>
    %cst_18 = arith.constant 0.000000e+00 : f32
    %37 = vector.broadcast %cst_18 : f32 to vector<16x64xf32>
    %38 = arith.subf %37, %16 : vector<16x64xf32>
    %39 = arith.mulf %38, %16 : vector<16x64xf32>
    %40 = math.exp %39 : vector<16x64xf32>
    %41 = arith.mulf %36, %40 : vector<16x64xf32>
    %cst_19 = arith.constant 1.000000e+00 : f32
    %42 = vector.broadcast %cst_19 : f32 to vector<16x64xf32>
    %43 = arith.subf %42, %41 : vector<16x64xf32>
    %44 = arith.mulf %15, %43 : vector<16x64xf32>
    %cst_20 = arith.constant 1.000000e+00 : f32
    %45 = vector.broadcast %cst_20 : f32 to vector<16x64xf32>
    %46 = arith.addf %45, %44 : vector<16x64xf32>
    %47 = arith.mulf %8, %46 : vector<16x64xf32>
    %48 = arith.truncf %47 : vector<16x64xf32> to vector<16x64xbf16>
    %c0_21 = arith.constant 0 : index
    %c0_22 = arith.constant 0 : index
    %49 = vector.load %arg4[%c0_21, %c0_22] : memref<64x32xbf16, #tpu.memory_space<vmem>>, vector<64x32xbf16>
    %cst_23 = arith.constant dense<0.000000e+00> : vector<16x32xf32>
    %50 = tpu.matmul %48, %49, %cst_23 {dimension_numbers = #tpu.dot_dimension_numbers<[1], [0], [0], [1], [0, 0, 1, 1], [], []>} : vector<16x64xbf16>, vector<64x32xbf16>, vector<16x32xf32> -> vector<16x32xf32>
    %c0_24 = arith.constant 0 : index
    %c0_25 = arith.constant 0 : index
    %51 = vector.load %arg5[%c0_24, %c0_25] : memref<1x32xf32, #tpu.memory_space<vmem>>, vector<1x32xf32>
    %52 = vector.broadcast %51 : vector<1x32xf32> to vector<16x32xf32>
    %53 = arith.addf %50, %52 : vector<16x32xf32>
    %54 = arith.addf %0, %53 : vector<16x32xf32>
    %c0_26 = arith.constant 0 : index
    %c0_27 = arith.constant 0 : index
    %55 = vector.load %arg6[%c0_26, %c0_27] : memref<1x32xf32, #tpu.memory_space<vmem>>, vector<1x32xf32>
    %c0_28 = arith.constant 0 : index
    %c0_29 = arith.constant 0 : index
    %56 = vector.load %arg7[%c0_28, %c0_29] : memref<1x32xf32, #tpu.memory_space<vmem>>, vector<1x32xf32>
    %cst_30 = arith.constant dense<0.000000e+00> : vector<16xf32>
    %57 = vector.multi_reduction <add>, %54, %cst_30 [1] : vector<16x32xf32> to vector<16xf32>
    %58 = vector.shape_cast %57 : vector<16xf32> to vector<16x1xf32>
    %cst_31 = arith.constant 3.200000e+01 : f32
    %59 = vector.broadcast %cst_31 : f32 to vector<16x1xf32>
    %60 = arith.divf %58, %59 : vector<16x1xf32>
    %61 = vector.broadcast %60 : vector<16x1xf32> to vector<16x32xf32>
    %62 = arith.subf %54, %61 : vector<16x32xf32>
    %63 = arith.mulf %62, %62 : vector<16x32xf32>
    %cst_32 = arith.constant dense<0.000000e+00> : vector<16xf32>
    %64 = vector.multi_reduction <add>, %63, %cst_32 [1] : vector<16x32xf32> to vector<16xf32>
    %65 = vector.shape_cast %64 : vector<16xf32> to vector<16x1xf32>
    %cst_33 = arith.constant 3.200000e+01 : f32
    %66 = vector.broadcast %cst_33 : f32 to vector<16x1xf32>
    %67 = arith.divf %65, %66 : vector<16x1xf32>
    %cst_34 = arith.constant 9.99999996E-13 : f32
    %68 = vector.broadcast %cst_34 : f32 to vector<16x1xf32>
    %69 = arith.addf %67, %68 : vector<16x1xf32>
    %70 = math.rsqrt %69 : vector<16x1xf32>
    %71 = vector.broadcast %70 : vector<16x1xf32> to vector<16x32xf32>
    %72 = arith.mulf %62, %71 : vector<16x32xf32>
    %73 = vector.broadcast %55 : vector<1x32xf32> to vector<16x32xf32>
    %74 = arith.mulf %72, %73 : vector<16x32xf32>
    %75 = vector.broadcast %56 : vector<1x32xf32> to vector<16x32xf32>
    %76 = arith.addf %74, %75 : vector<16x32xf32>
    %c0_35 = arith.constant 0 : index
    %c0_36 = arith.constant 0 : index
    %77 = vector.load %arg8[%c0_35, %c0_36] : memref<16x32xf32, #tpu.memory_space<vmem>>, vector<16x32xf32>
    tpu.vector_store %arg8[%c0_35, %c0_36], %76 {strides = array<i32>} : memref<16x32xf32, #tpu.memory_space<vmem>>, vector<16x32xf32>,
    return
  }
  func.func @transform_0(%arg0: i32) -> (i32, i32) {
    %c0_i32 = arith.constant 0 : i32
    %c0_i32_0 = arith.constant 0 : i32
    return %arg0, %c0_i32 : i32, i32
  }
  func.func @transform_1(%arg0: i32) -> (i32, i32) {
    %c0_i32 = arith.constant 0 : i32
    %c0_i32_0 = arith.constant 0 : i32
    %c0_i32_1 = arith.constant 0 : i32
    return %c0_i32, %c0_i32_0 : i32, i32
  }
  func.func @transform_2(%arg0: i32) -> (i32, i32) {
    %c0_i32 = arith.constant 0 : i32
    %c0_i32_0 = arith.constant 0 : i32
    %c0_i32_1 = arith.constant 0 : i32
    return %c0_i32, %c0_i32_0 : i32, i32
  }
  func.func @transform_3(%arg0: i32) -> (i32, i32) {
    %c0_i32 = arith.constant 0 : i32
    %c0_i32_0 = arith.constant 0 : i32
    %c0_i32_1 = arith.constant 0 : i32
    return %c0_i32, %c0_i32_0 : i32, i32
  }
  func.func @transform_4(%arg0: i32) -> (i32, i32) {
    %c0_i32 = arith.constant 0 : i32
    %c0_i32_0 = arith.constant 0 : i32
    %c0_i32_1 = arith.constant 0 : i32
    return %c0_i32, %c0_i32_0 : i32, i32
  }
  func.func @transform_5(%arg0: i32) -> (i32, i32) {
    %c0_i32 = arith.constant 0 : i32
    %c0_i32_0 = arith.constant 0 : i32
    %c0_i32_1 = arith.constant 0 : i32
    return %c0_i32, %c0_i32_0 : i32, i32
  }
  func.func @transform_6(%arg0: i32) -> (i32, i32) {
    %c0_i32 = arith.constant 0 : i32
    %c0_i32_0 = arith.constant 0 : i32
    %c0_i32_1 = arith.constant 0 : i32
    return %c0_i32, %c0_i32_0 : i32, i32
  }
  func.func @transform_7(%arg0: i32) -> (i32, i32) {
    %c0_i32 = arith.constant 0 : i32
    %c0_i32_0 = arith.constant 0 : i32
    return %arg0, %c0_i32 : i32, i32
  }
}

module attributes {stable_mosaic.version = 11 : i64} {
  func.func @kernel(%arg0: i32, %arg1: memref<16x32xbf16, #tpu.memory_space<vmem>>, %arg2: memref<16x32xf32, #tpu.memory_space<vmem>>, %arg3: memref<32x32xbf16, #tpu.memory_space<vmem>>, %arg4: memref<1x32xf32, #tpu.memory_space<vmem>>, %arg5: memref<1x32xf32, #tpu.memory_space<vmem>>, %arg6: memref<1x32xf32, #tpu.memory_space<vmem>>, %arg7: memref<16x32xf32, #tpu.memory_space<vmem>>) attributes {dimension_semantics = [#tpu.dimension_semantics<parallel>], iteration_bounds = array<i64: 1>, scalar_prefetch = 0 : i64, scratch_operands = 0 : i64, tpu.core_type = #tpu.core_type<tc>, window_params = [{transform_indices = @transform_0, window_bounds = array<i64: 16, 32>}, {transform_indices = @transform_1, window_bounds = array<i64: 16, 32>}, {pipeline_mode = #tpu.pipeline_mode<synchronous>, transform_indices = @transform_2, window_bounds = array<i64: 32, 32>}, {pipeline_mode = #tpu.pipeline_mode<synchronous>, transform_indices = @transform_3, window_bounds = array<i64: 1, 32>}, {pipeline_mode = #tpu.pipeline_mode<synchronous>, transform_indices = @transform_4, window_bounds = array<i64: 1, 32>}, {pipeline_mode = #tpu.pipeline_mode<synchronous>, transform_indices = @transform_5, window_bounds = array<i64: 1, 32>}, {transform_indices = @transform_6, window_bounds = array<i64: 16, 32>}]} {
    %c0 = arith.constant 0 : index
    %c0_0 = arith.constant 0 : index
    %0 = vector.load %arg1[%c0, %c0_0] : memref<16x32xbf16, #tpu.memory_space<vmem>>, vector<16x32xbf16>
    %c0_1 = arith.constant 0 : index
    %c0_2 = arith.constant 0 : index
    %1 = vector.load %arg3[%c0_1, %c0_2] : memref<32x32xbf16, #tpu.memory_space<vmem>>, vector<32x32xbf16>
    %cst = arith.constant dense<0.000000e+00> : vector<16x32xf32>
    %2 = tpu.matmul %0, %1, %cst {dimension_numbers = #tpu.dot_dimension_numbers<[1], [0], [0], [1], [0, 0, 1, 1], [], []>} : vector<16x32xbf16>, vector<32x32xbf16>, vector<16x32xf32> -> vector<16x32xf32>
    %c0_3 = arith.constant 0 : index
    %c0_4 = arith.constant 0 : index
    %3 = vector.load %arg4[%c0_3, %c0_4] : memref<1x32xf32, #tpu.memory_space<vmem>>, vector<1x32xf32>
    %4 = vector.broadcast %3 : vector<1x32xf32> to vector<16x32xf32>
    %5 = arith.addf %2, %4 : vector<16x32xf32>
    %c0_5 = arith.constant 0 : index
    %c0_6 = arith.constant 0 : index
    %6 = vector.load %arg2[%c0_5, %c0_6] : memref<16x32xf32, #tpu.memory_space<vmem>>, vector<16x32xf32>
    %7 = arith.addf %6, %5 : vector<16x32xf32>
    %c0_7 = arith.constant 0 : index
    %c0_8 = arith.constant 0 : index
    %8 = vector.load %arg5[%c0_7, %c0_8] : memref<1x32xf32, #tpu.memory_space<vmem>>, vector<1x32xf32>
    %c0_9 = arith.constant 0 : index
    %c0_10 = arith.constant 0 : index
    %9 = vector.load %arg6[%c0_9, %c0_10] : memref<1x32xf32, #tpu.memory_space<vmem>>, vector<1x32xf32>
    %cst_11 = arith.constant dense<0.000000e+00> : vector<16xf32>
    %10 = vector.multi_reduction <add>, %7, %cst_11 [1] : vector<16x32xf32> to vector<16xf32>
    %11 = vector.shape_cast %10 : vector<16xf32> to vector<16x1xf32>
    %cst_12 = arith.constant 3.200000e+01 : f32
    %12 = vector.broadcast %cst_12 : f32 to vector<16x1xf32>
    %13 = arith.divf %11, %12 : vector<16x1xf32>
    %14 = vector.broadcast %13 : vector<16x1xf32> to vector<16x32xf32>
    %15 = arith.subf %7, %14 : vector<16x32xf32>
    %16 = arith.mulf %15, %15 : vector<16x32xf32>
    %cst_13 = arith.constant dense<0.000000e+00> : vector<16xf32>
    %17 = vector.multi_reduction <add>, %16, %cst_13 [1] : vector<16x32xf32> to vector<16xf32>
    %18 = vector.shape_cast %17 : vector<16xf32> to vector<16x1xf32>
    %cst_14 = arith.constant 3.200000e+01 : f32
    %19 = vector.broadcast %cst_14 : f32 to vector<16x1xf32>
    %20 = arith.divf %18, %19 : vector<16x1xf32>
    %cst_15 = arith.constant 9.99999996E-13 : f32
    %21 = vector.broadcast %cst_15 : f32 to vector<16x1xf32>
    %22 = arith.addf %20, %21 : vector<16x1xf32>
    %23 = math.rsqrt %22 : vector<16x1xf32>
    %24 = vector.broadcast %23 : vector<16x1xf32> to vector<16x32xf32>
    %25 = arith.mulf %15, %24 : vector<16x32xf32>
    %26 = vector.broadcast %8 : vector<1x32xf32> to vector<16x32xf32>
    %27 = arith.mulf %25, %26 : vector<16x32xf32>
    %28 = vector.broadcast %9 : vector<1x32xf32> to vector<16x32xf32>
    %29 = arith.addf %27, %28 : vector<16x32xf32>
    %c0_16 = arith.constant 0 : index
    %c0_17 = arith.constant 0 : index
    %30 = vector.load %arg7[%c0_16, %c0_17] : memref<16x32xf32, #tpu.memory_space<vmem>>, vector<16x32xf32>
    tpu.vector_store %arg7[%c0_16, %c0_17], %29 {strides = array<i32>} : memref<16x32xf32, #tpu.memory_space<vmem>>, vector<16x32xf32>,
    return
  }
  func.func @transform_0(%arg0: i32) -> (i32, i32) {
    %c0_i32 = arith.constant 0 : i32
    %c0_i32_0 = arith.constant 0 : i32
    return %arg0, %c0_i32 : i32, i32
  }
  func.func @transform_1(%arg0: i32) -> (i32, i32) {
    %c0_i32 = arith.constant 0 : i32
    %c0_i32_0 = arith.constant 0 : i32
    return %arg0, %c0_i32 : i32, i32
  }
  func.func @transform_2(%arg0: i32) -> (i32, i32) {
    %c0_i32 = arith.constant 0 : i32
    %c0_i32_0 = arith.constant 0 : i32
    %c0_i32_1 = arith.constant 0 : i32
    return %c0_i32, %c0_i32_0 : i32, i32
  }
  func.func @transform_3(%arg0: i32) -> (i32, i32) {
    %c0_i32 = arith.constant 0 : i32
    %c0_i32_0 = arith.constant 0 : i32
    %c0_i32_1 = arith.constant 0 : i32
    return %c0_i32, %c0_i32_0 : i32, i32
  }
  func.func @transform_4(%arg0: i32) -> (i32, i32) {
    %c0_i32 = arith.constant 0 : i32
    %c0_i32_0 = arith.constant 0 : i32
    %c0_i32_1 = arith.constant 0 : i32
    return %c0_i32, %c0_i32_0 : i32, i32
  }
  func.func @transform_5(%arg0: i32) -> (i32, i32) {
    %c0_i32 = arith.constant 0 : i32
    %c0_i32_0 = arith.constant 0 : i32
    %c0_i32_1 = arith.constant 0 : i32
    return %c0_i32, %c0_i32_0 : i32, i32
  }
  func.func @transform_6(%arg0: i32) -> (i32, i32) {
    %c0_i32 = arith.constant 0 : i32
    %c0_i32_0 = arith.constant 0 : i32
    return %arg0, %c0_i32 : i32, i32
  }
}

module attributes {stable_mosaic.version = 11 : i64} {
  func.func @kernel(%arg0: i32, %arg1: memref<16x32xf32, #tpu.memory_space<vmem>>, %arg2: memref<32x96xbf16, #tpu.memory_space<vmem>>, %arg3: memref<1x96xf32, #tpu.memory_space<vmem>>, %arg4: memref<16x32xbf16, #tpu.memory_space<vmem>>, %arg5: memref<16x32xbf16, #tpu.memory_space<vmem>>, %arg6: memref<16x32xbf16, #tpu.memory_space<vmem>>) attributes {dimension_semantics = [#tpu.dimension_semantics<parallel>], iteration_bounds = array<i64: 1>, scalar_prefetch = 0 : i64, scratch_operands = 0 : i64, tpu.core_type = #tpu.core_type<tc>, window_params = [{transform_indices = @transform_0, window_bounds = array<i64: 16, 32>}, {pipeline_mode = #tpu.pipeline_mode<synchronous>, transform_indices = @transform_1, window_bounds = array<i64: 32, 96>}, {pipeline_mode = #tpu.pipeline_mode<synchronous>, transform_indices = @transform_2, window_bounds = array<i64: 1, 96>}, {transform_indices = @transform_3, window_bounds = array<i64: 16, 32>}, {transform_indices = @transform_4, window_bounds = array<i64: 16, 32>}, {transform_indices = @transform_5, window_bounds = array<i64: 16, 32>}]} {
    %c0 = arith.constant 0 : index
    %c0_0 = arith.constant 0 : index
    %0 = vector.load %arg1[%c0, %c0_0] : memref<16x32xf32, #tpu.memory_space<vmem>>, vector<16x32xf32>
    %1 = arith.truncf %0 : vector<16x32xf32> to vector<16x32xbf16>
    %c0_1 = arith.constant 0 : index
    %c0_2 = arith.constant 0 : index
    %2 = vector.load %arg2[%c0_1, %c0_2] : memref<32x96xbf16, #tpu.memory_space<vmem>>, vector<32x96xbf16>
    %cst = arith.constant dense<0.000000e+00> : vector<16x96xf32>
    %3 = tpu.matmul %1, %2, %cst {dimension_numbers = #tpu.dot_dimension_numbers<[1], [0], [0], [1], [0, 0, 1, 1], [], []>} : vector<16x32xbf16>, vector<32x96xbf16>, vector<16x96xf32> -> vector<16x96xf32>
    %c0_3 = arith.constant 0 : index
    %c0_4 = arith.constant 0 : index
    %4 = vector.load %arg3[%c0_3, %c0_4] : memref<1x96xf32, #tpu.memory_space<vmem>>, vector<1x96xf32>
    %5 = vector.broadcast %4 : vector<1x96xf32> to vector<16x96xf32>
    %6 = arith.addf %3, %5 : vector<16x96xf32>
    %7 = vector.extract_strided_slice %6 {offsets = [0, 0], sizes = [16, 32], strides = [1, 1]} : vector<16x96xf32> to vector<16x32xf32>
    %8 = arith.truncf %7 : vector<16x32xf32> to vector<16x32xbf16>
    %c0_5 = arith.constant 0 : index
    %c0_6 = arith.constant 0 : index
    %9 = vector.load %arg4[%c0_5, %c0_6] : memref<16x32xbf16, #tpu.memory_space<vmem>>, vector<16x32xbf16>
    tpu.vector_store %arg4[%c0_5, %c0_6], %8 {strides = array<i32>} : memref<16x32xbf16, #tpu.memory_space<vmem>>, vector<16x32xbf16>,
    %10 = vector.extract_strided_slice %6 {offsets = [0, 32], sizes = [16, 32], strides = [1, 1]} : vector<16x96xf32> to vector<16x32xf32>
    %11 = arith.truncf %10 : vector<16x32xf32> to vector<16x32xbf16>
    %c0_7 = arith.constant 0 : index
    %c0_8 = arith.constant 0 : index
    %12 = vector.load %arg5[%c0_7, %c0_8] : memref<16x32xbf16, #tpu.memory_space<vmem>>, vector<16x32xbf16>
    tpu.vector_store %arg5[%c0_7, %c0_8], %11 {strides = array<i32>} : memref<16x32xbf16, #tpu.memory_space<vmem>>, vector<16x32xbf16>,
    %13 = vector.extract_strided_slice %6 {offsets = [0, 64], sizes = [16, 32], strides = [1, 1]} : vector<16x96xf32> to vector<16x32xf32>
    %14 = arith.truncf %13 : vector<16x32xf32> to vector<16x32xbf16>
    %c0_9 = arith.constant 0 : index
    %c0_10 = arith.constant 0 : index
    %15 = vector.load %arg6[%c0_9, %c0_10] : memref<16x32xbf16, #tpu.memory_space<vmem>>, vector<16x32xbf16>
    tpu.vector_store %arg6[%c0_9, %c0_10], %14 {strides = array<i32>} : memref<16x32xbf16, #tpu.memory_space<vmem>>, vector<16x32xbf16>,
    return
  }
  func.func @transform_0(%arg0: i32) -> (i32, i32) {
    %c0_i32 = arith.constant 0 : i32
    %c0_i32_0 = arith.constant 0 : i32
    return %arg0, %c0_i32 : i32, i32
  }
  func.func @transform_1(%arg0: i32) -> (i32, i32) {
    %c0_i32 = arith.constant 0 : i32
    %c0_i32_0 = arith.constant 0 : i32
    %c0_i32_1 = arith.constant 0 : i32
    return %c0_i32, %c0_i32_0 : i32, i32
  }
  func.func @transform_2(%arg0: i32) -> (i32, i32) {
    %c0_i32 = arith.constant 0 : i32
    %c0_i32_0 = arith.constant 0 : i32
    %c0_i32_1 = arith.constant 0 : i32
    return %c0_i32, %c0_i32_0 : i32, i32
  }
  func.func @transform_3(%arg0: i32) -> (i32, i32) {
    %c0_i32 = arith.constant 0 : i32
    %c0_i32_0 = arith.constant 0 : i32
    return %arg0, %c0_i32 : i32, i32
  }
  func.func @transform_4(%arg0: i32) -> (i32, i32) {
    %c0_i32 = arith.constant 0 : i32
    %c0_i32_0 = arith.constant 0 : i32
    return %arg0, %c0_i32 : i32, i32
  }
  func.func @transform_5(%arg0: i32) -> (i32, i32) {
    %c0_i32 = arith.constant 0 : i32
    %c0_i32_0 = arith.constant 0 : i32
    return %arg0, %c0_i32 : i32, i32
  }
}

module attributes {stable_mosaic.version = 11 : i64} {
  func.func @kernel(%arg0: i32, %arg1: i32, %arg2: memref<1x8x32xbf16, #tpu.memory_space<vmem>>, %arg3: memref<1x8x32xbf16, #tpu.memory_space<vmem>>, %arg4: memref<1x8x32xbf16, #tpu.memory_space<vmem>>, %arg5: memref<1x1x8xf32, #tpu.memory_space<vmem>>, %arg6: memref<1x8x32xbf16, #tpu.memory_space<vmem>>, %arg7: memref<1x4x8x8xf32, #tpu.memory_space<vmem>>, %arg8: memref<8x32xf32, #tpu.memory_space<vmem>>) attributes {dimension_semantics = [#tpu.dimension_semantics<parallel>, #tpu.dimension_semantics<parallel>], iteration_bounds = array<i64: 2, 1>, scalar_prefetch = 0 : i64, scratch_operands = 1 : i64, tpu.core_type = #tpu.core_type<tc>, window_params = [{transform_indices = @transform_0, window_bounds = array<i64: 1, 8, 32>}, {transform_indices = @transform_1, window_bounds = array<i64: 1, 8, 32>}, {transform_indices = @transform_2, window_bounds = array<i64: 1, 8, 32>}, {transform_indices = @transform_3, window_bounds = array<i64: 1, 1, 8>}, {transform_indices = @transform_4, window_bounds = array<i64: 1, 8, 32>}, {transform_indices = @transform_5, window_bounds = array<i64: 1, 4, 8, 8>}]} {
    %c0 = arith.constant 0 : index
    %c0_0 = arith.constant 0 : index
    %c0_1 = arith.constant 0 : index
    %0 = vector.load %arg2[%c0, %c0_0, %c0_1] : memref<1x8x32xbf16, #tpu.memory_space<vmem>>, vector<1x8x32xbf16>
    %1 = vector.shape_cast %0 : vector<1x8x32xbf16> to vector<8x32xbf16>
    %c0_2 = arith.constant 0 : index
    %c0_3 = arith.constant 0 : index
    %c0_4 = arith.constant 0 : index
    %2 = vector.load %arg3[%c0_2, %c0_3, %c0_4] : memref<1x8x32xbf16, #tpu.memory_space<vmem>>, vector<1x8x32xbf16>
    %3 = vector.shape_cast %2 : vector<1x8x32xbf16> to vector<8x32xbf16>
    %c0_5 = arith.constant 0 : index
    %c0_6 = arith.constant 0 : index
    %c0_7 = arith.constant 0 : index
    %4 = vector.load %arg4[%c0_5, %c0_6, %c0_7] : memref<1x8x32xbf16, #tpu.memory_space<vmem>>, vector<1x8x32xbf16>
    %5 = vector.shape_cast %4 : vector<1x8x32xbf16> to vector<8x32xbf16>
    %c0_8 = arith.constant 0 : index
    %c0_9 = arith.constant 0 : index
    %c0_10 = arith.constant 0 : index
    %6 = vector.load %arg5[%c0_8, %c0_9, %c0_10] : memref<1x1x8xf32, #tpu.memory_space<vmem>>, vector<1x1x8xf32>
    %7 = vector.shape_cast %6 : vector<1x1x8xf32> to vector<1x8xf32>
    %cst = arith.constant 5.000000e-01 : f32
    %8 = vector.broadcast %cst : f32 to vector<1x8xf32>
    %9 = arith.cmpf ogt, %7, %8 : vector<1x8xf32>
    %cst_11 = arith.constant -8.99999948E+9 : f32
    %cst_12 = arith.constant 0.000000e+00 : f32
    %10 = vector.broadcast %cst_11 : f32 to vector<1x8xf32>
    %11 = vector.broadcast %cst_12 : f32 to vector<1x8xf32>
    %12 = arith.select %9, %10, %11 : vector<1x8xi1>, vector<1x8xf32>
    %13 = vector.extract_strided_slice %1 {offsets = [0, 0], sizes = [8, 8], strides = [1, 1]} : vector<8x32xbf16> to vector<8x8xbf16>
    %14 = vector.extract_strided_slice %3 {offsets = [0, 0], sizes = [8, 8], strides = [1, 1]} : vector<8x32xbf16> to vector<8x8xbf16>
    %cst_13 = arith.constant dense<0.000000e+00> : vector<8x8xf32>
    %15 = tpu.matmul %13, %14, %cst_13 {dimension_numbers = #tpu.dot_dimension_numbers<[1], [1], [0], [0], [0, 0, 1, 0], [], []>} : vector<8x8xbf16>, vector<8x8xbf16>, vector<8x8xf32> -> vector<8x8xf32>
    %16 = vector.broadcast %12 : vector<1x8xf32> to vector<8x8xf32>
    %17 = arith.addf %15, %16 : vector<8x8xf32>
    %cst_14 = arith.constant dense<0xFF800000> : vector<8xf32>
    %18 = vector.multi_reduction <maximumf>, %17, %cst_14 [1] : vector<8x8xf32> to vector<8xf32>
    %19 = vector.shape_cast %18 : vector<8xf32> to vector<8x1xf32>
    %20 = vector.broadcast %19 : vector<8x1xf32> to vector<8x8xf32>
    %21 = arith.subf %17, %20 : vector<8x8xf32>
    %22 = math.exp %21 : vector<8x8xf32>
    %cst_15 = arith.constant dense<0.000000e+00> : vector<8xf32>
    %23 = vector.multi_reduction <add>, %22, %cst_15 [1] : vector<8x8xf32> to vector<8xf32>
    %24 = vector.shape_cast %23 : vector<8xf32> to vector<8x1xf32>
    %25 = tpu.reciprocal %24 {approx = true} : vector<8x1xf32> -> vector<8x1xf32>
    %26 = vector.broadcast %25 : vector<8x1xf32> to vector<8x8xf32>
    %27 = arith.mulf %22, %26 : vector<8x8xf32>
    %c0_16 = arith.constant 0 : index
    %c0_17 = arith.constant 0 : index
    %c0_18 = arith.constant 0 : index
    %c0_19 = arith.constant 0 : index
    %28 = vector.load %arg7[%c0_16, %c0_17, %c0_18, %c0_19] : memref<1x4x8x8xf32, #tpu.memory_space<vmem>>, vector<1x1x8x8xf32>
    %29 = vector.shape_cast %28 : vector<1x1x8x8xf32> to vector<8x8xf32>
    %30 = vector.shape_cast %27 : vector<8x8xf32> to vector<1x1x8x8xf32>
    tpu.vector_store %arg7[%c0_16, %c0_17, %c0_18, %c0_19], %30 {strides = array<i32>} : memref<1x4x8x8xf32, #tpu.memory_space<vmem>>, vector<1x1x8x8xf32>,
    %31 = arith.truncf %27 : vector<8x8xf32> to vector<8x8xbf16>
    %32 = vector.extract_strided_slice %5 {offsets = [0, 0], sizes = [8, 8], strides = [1, 1]} : vector<8x32xbf16> to vector<8x8xbf16>
    %cst_20 = arith.constant dense<0.000000e+00> : vector<8x8xf32>
    %33 = tpu.matmul %31, %32, %cst_20 {dimension_numbers = #tpu.dot_dimension_numbers<[1], [0], [0], [1], [0, 0, 1, 1], [], []>} : vector<8x8xbf16>, vector<8x8xbf16>, vector<8x8xf32> -> vector<8x8xf32>
    %c0_21 = arith.constant 0 : index
    %c0_22 = arith.constant 0 : index
    %34 = vector.load %arg8[%c0_21, %c0_22] : memref<8x32xf32, #tpu.memory_space<vmem>>, vector<8x8xf32>
    tpu.vector_store %arg8[%c0_21, %c0_22], %33 {strides = array<i32>} : memref<8x32xf32, #tpu.memory_space<vmem>>, vector<8x8xf32>,
    %35 = vector.extract_strided_slice %1 {offsets = [0, 8], sizes = [8, 8], strides = [1, 1]} : vector<8x32xbf16> to vector<8x8xbf16>
    %36 = vector.extract_strided_slice %3 {offsets = [0, 8], sizes = [8, 8], strides = [1, 1]} : vector<8x32xbf16> to vector<8x8xbf16>
    %cst_23 = arith.constant dense<0.000000e+00> : vector<8x8xf32>
    %37 = tpu.matmul %35, %36, %cst_23 {dimension_numbers = #tpu.dot_dimension_numbers<[1], [1], [0], [0], [0, 0, 1, 0], [], []>} : vector<8x8xbf16>, vector<8x8xbf16>, vector<8x8xf32> -> vector<8x8xf32>
    %38 = vector.broadcast %12 : vector<1x8xf32> to vector<8x8xf32>
    %39 = arith.addf %37, %38 : vector<8x8xf32>
    %cst_24 = arith.constant dense<0xFF800000> : vector<8xf32>
    %40 = vector.multi_reduction <maximumf>, %39, %cst_24 [1] : vector<8x8xf32> to vector<8xf32>
    %41 = vector.shape_cast %40 : vector<8xf32> to vector<8x1xf32>
    %42 = vector.broadcast %41 : vector<8x1xf32> to vector<8x8xf32>
    %43 = arith.subf %39, %42 : vector<8x8xf32>
    %44 = math.exp %43 : vector<8x8xf32>
    %cst_25 = arith.constant dense<0.000000e+00> : vector<8xf32>
    %45 = vector.multi_reduction <add>, %44, %cst_25 [1] : vector<8x8xf32> to vector<8xf32>
    %46 = vector.shape_cast %45 : vector<8xf32> to vector<8x1xf32>
    %47 = tpu.reciprocal %46 {approx = true} : vector<8x1xf32> -> vector<8x1xf32>
    %48 = vector.broadcast %47 : vector<8x1xf32> to vector<8x8xf32>
    %49 = arith.mulf %44, %48 : vector<8x8xf32>
    %c0_26 = arith.constant 0 : index
    %c1 = arith.constant 1 : index
    %c0_27 = arith.constant 0 : index
    %c0_28 = arith.constant 0 : index
    %50 = vector.load %arg7[%c0_26, %c1, %c0_27, %c0_28] : memref<1x4x8x8xf32, #tpu.memory_space<vmem>>, vector<1x1x8x8xf32>
    %51 = vector.shape_cast %50 : vector<1x1x8x8xf32> to vector<8x8xf32>
    %52 = vector.shape_cast %49 : vector<8x8xf32> to vector<1x1x8x8xf32>
    tpu.vector_store %arg7[%c0_26, %c1, %c0_27, %c0_28], %52 {strides = array<i32>} : memref<1x4x8x8xf32, #tpu.memory_space<vmem>>, vector<1x1x8x8xf32>,
    %53 = arith.truncf %49 : vector<8x8xf32> to vector<8x8xbf16>
    %54 = vector.extract_strided_slice %5 {offsets = [0, 8], sizes = [8, 8], strides = [1, 1]} : vector<8x32xbf16> to vector<8x8xbf16>
    %cst_29 = arith.constant dense<0.000000e+00> : vector<8x8xf32>
    %55 = tpu.matmul %53, %54, %cst_29 {dimension_numbers = #tpu.dot_dimension_numbers<[1], [0], [0], [1], [0, 0, 1, 1], [], []>} : vector<8x8xbf16>, vector<8x8xbf16>, vector<8x8xf32> -> vector<8x8xf32>
    %c0_30 = arith.constant 0 : index
    %c8 = arith.constant 8 : index
    %56 = vector.load %arg8[%c0_30, %c8] : memref<8x32xf32, #tpu.memory_space<vmem>>, vector<8x8xf32>
    tpu.vector_store %arg8[%c0_30, %c8], %55 {strides = array<i32>} : memref<8x32xf32, #tpu.memory_space<vmem>>, vector<8x8xf32>,
    %57 = vector.extract_strided_slice %1 {offsets = [0, 16], sizes = [8, 8], strides = [1, 1]} : vector<8x32xbf16> to vector<8x8xbf16>
    %58 = vector.extract_strided_slice %3 {offsets = [0, 16], sizes = [8, 8], strides = [1, 1]} : vector<8x32xbf16> to vector<8x8xbf16>
    %cst_31 = arith.constant dense<0.000000e+00> : vector<8x8xf32>
    %59 = tpu.matmul %57, %58, %cst_31 {dimension_numbers = #tpu.dot_dimension_numbers<[1], [1], [0], [0], [0, 0, 1, 0], [], []>} : vector<8x8xbf16>, vector<8x8xbf16>, vector<8x8xf32> -> vector<8x8xf32>
    %60 = vector.broadcast %12 : vector<1x8xf32> to vector<8x8xf32>
    %61 = arith.addf %59, %60 : vector<8x8xf32>
    %cst_32 = arith.constant dense<0xFF800000> : vector<8xf32>
    %62 = vector.multi_reduction <maximumf>, %61, %cst_32 [1] : vector<8x8xf32> to vector<8xf32>
    %63 = vector.shape_cast %62 : vector<8xf32> to vector<8x1xf32>
    %64 = vector.broadcast %63 : vector<8x1xf32> to vector<8x8xf32>
    %65 = arith.subf %61, %64 : vector<8x8xf32>
    %66 = math.exp %65 : vector<8x8xf32>
    %cst_33 = arith.constant dense<0.000000e+00> : vector<8xf32>
    %67 = vector.multi_reduction <add>, %66, %cst_33 [1] : vector<8x8xf32> to vector<8xf32>
    %68 = vector.shape_cast %67 : vector<8xf32> to vector<8x1xf32>
    %69 = tpu.reciprocal %68 {approx = true} : vector<8x1xf32> -> vector<8x1xf32>
    %70 = vector.broadcast %69 : vector<8x1xf32> to vector<8x8xf32>
    %71 = arith.mulf %66, %70 : vector<8x8xf32>
    %c0_34 = arith.constant 0 : index
    %c2 = arith.constant 2 : index
    %c0_35 = arith.constant 0 : index
    %c0_36 = arith.constant 0 : index
    %72 = vector.load %arg7[%c0_34, %c2, %c0_35, %c0_36] : memref<1x4x8x8xf32, #tpu.memory_space<vmem>>, vector<1x1x8x8xf32>
    %73 = vector.shape_cast %72 : vector<1x1x8x8xf32> to vector<8x8xf32>
    %74 = vector.shape_cast %71 : vector<8x8xf32> to vector<1x1x8x8xf32>
    tpu.vector_store %arg7[%c0_34, %c2, %c0_35, %c0_36], %74 {strides = array<i32>} : memref<1x4x8x8xf32, #tpu.memory_space<vmem>>, vector<1x1x8x8xf32>,
    %75 = arith.truncf %71 : vector<8x8xf32> to vector<8x8xbf16>
    %76 = vector.extract_strided_slice %5 {offsets = [0, 16], sizes = [8, 8], strides = [1, 1]} : vector<8x32xbf16> to vector<8x8xbf16>
    %cst_37 = arith.constant dense<0.000000e+00> : vector<8x8xf32>
    %77 = tpu.matmul %75, %76, %cst_37 {dimension_numbers = #tpu.dot_dimension_numbers<[1], [0], [0], [1], [0, 0, 1, 1], [], []>} : vector<8x8xbf16>, vector<8x8xbf16>, vector<8x8xf32> -> vector<8x8xf32>
    %c0_38 = arith.constant 0 : index
    %c16 = arith.constant 16 : index
    %78 = vector.load %arg8[%c0_38, %c16] : memref<8x32xf32, #tpu.memory_space<vmem>>, vector<8x8xf32>
    tpu.vector_store %arg8[%c0_38, %c16], %77 {strides = array<i32>} : memref<8x32xf32, #tpu.memory_space<vmem>>, vector<8x8xf32>,
    %79 = vector.extract_strided_slice %1 {offsets = [0, 24], sizes = [8, 8], strides = [1, 1]} : vector<8x32xbf16> to vector<8x8xbf16>
    %80 = vector.extract_strided_slice %3 {offsets = [0, 24], sizes = [8, 8], strides = [1, 1]} : vector<8x32xbf16> to vector<8x8xbf16>
    %cst_39 = arith.constant dense<0.000000e+00> : vector<8x8xf32>
    %81 = tpu.matmul %79, %80, %cst_39 {dimension_numbers = #tpu.dot_dimension_numbers<[1], [1], [0], [0], [0, 0, 1, 0], [], []>} : vector<8x8xbf16>, vector<8x8xbf16>, vector<8x8xf32> -> vector<8x8xf32>
    %82 = vector.broadcast %12 : vector<1x8xf32> to vector<8x8xf32>
    %83 = arith.addf %81, %82 : vector<8x8xf32>
    %cst_40 = arith.constant dense<0xFF800000> : vector<8xf32>
    %84 = vector.multi_reduction <maximumf>, %83, %cst_40 [1] : vector<8x8xf32> to vector<8xf32>
    %85 = vector.shape_cast %84 : vector<8xf32> to vector<8x1xf32>
    %86 = vector.broadcast %85 : vector<8x1xf32> to vector<8x8xf32>
    %87 = arith.subf %83, %86 : vector<8x8xf32>
    %88 = math.exp %87 : vector<8x8xf32>
    %cst_41 = arith.constant dense<0.000000e+00> : vector<8xf32>
    %89 = vector.multi_reduction <add>, %88, %cst_41 [1] : vector<8x8xf32> to vector<8xf32>
    %90 = vector.shape_cast %89 : vector<8xf32> to vector<8x1xf32>
    %91 = tpu.reciprocal %90 {approx = true} : vector<8x1xf32> -> vector<8x1xf32>
    %92 = vector.broadcast %91 : vector<8x1xf32> to vector<8x8xf32>
    %93 = arith.mulf %88, %92 : vector<8x8xf32>
    %c0_42 = arith.constant 0 : index
    %c3 = arith.constant 3 : index
    %c0_43 = arith.constant 0 : index
    %c0_44 = arith.constant 0 : index
    %94 = vector.load %arg7[%c0_42, %c3, %c0_43, %c0_44] : memref<1x4x8x8xf32, #tpu.memory_space<vmem>>, vector<1x1x8x8xf32>
    %95 = vector.shape_cast %94 : vector<1x1x8x8xf32> to vector<8x8xf32>
    %96 = vector.shape_cast %93 : vector<8x8xf32> to vector<1x1x8x8xf32>
    tpu.vector_store %arg7[%c0_42, %c3, %c0_43, %c0_44], %96 {strides = array<i32>} : memref<1x4x8x8xf32, #tpu.memory_space<vmem>>, vector<1x1x8x8xf32>,
    %97 = arith.truncf %93 : vector<8x8xf32> to vector<8x8xbf16>
    %98 = vector.extract_strided_slice %5 {offsets = [0, 24], sizes = [8, 8], strides = [1, 1]} : vector<8x32xbf16> to vector<8x8xbf16>
    %cst_45 = arith.constant dense<0.000000e+00> : vector<8x8xf32>
    %99 = tpu.matmul %97, %98, %cst_45 {dimension_numbers = #tpu.dot_dimension_numbers<[1], [0], [0], [1], [0, 0, 1, 1], [], []>} : vector<8x8xbf16>, vector<8x8xbf16>, vector<8x8xf32> -> vector<8x8xf32>
    %c0_46 = arith.constant 0 : index
    %c24 = arith.constant 24 : index
    %100 = vector.load %arg8[%c0_46, %c24] : memref<8x32xf32, #tpu.memory_space<vmem>>, vector<8x8xf32>
    tpu.vector_store %arg8[%c0_46, %c24], %99 {strides = array<i32>} : memref<8x32xf32, #tpu.memory_space<vmem>>, vector<8x8xf32>,
    %c0_47 = arith.constant 0 : index
    %c0_48 = arith.constant 0 : index
    %101 = vector.load %arg8[%c0_47, %c0_48] : memref<8x32xf32, #tpu.memory_space<vmem>>, vector<8x32xf32>
    %102 = arith.truncf %101 : vector<8x32xf32> to vector<8x32xbf16>
    %c0_49 = arith.constant 0 : index
    %c0_50 = arith.constant 0 : index
    %c0_51 = arith.constant 0 : index
    %103 = vector.load %arg6[%c0_49, %c0_50, %c0_51] : memref<1x8x32xbf16, #tpu.memory_space<vmem>>, vector<1x8x32xbf16>
    %104 = vector.shape_cast %103 : vector<1x8x32xbf16> to vector<8x32xbf16>
    %105 = vector.shape_cast %102 : vector<8x32xbf16> to vector<1x8x32xbf16>
    tpu.vector_store %arg6[%c0_49, %c0_50, %c0_51], %105 {strides = array<i32>} : memref<1x8x32xbf16, #tpu.memory_space<vmem>>, vector<1x8x32xbf16>,
    return
  }
  func.func @transform_0(%arg0: i32, %arg1: i32) -> (i32, i32, i32) {
    %c0_i32 = arith.constant 0 : i32
    %c0_i32_0 = arith.constant 0 : i32
    return %arg0, %arg1, %c0_i32 : i32, i32, i32
  }
  func.func @transform_1(%arg0: i32, %arg1: i32) -> (i32, i32, i32) {
    %c0_i32 = arith.constant 0 : i32
    %c0_i32_0 = arith.constant 0 : i32
    %c0_i32_1 = arith.constant 0 : i32
    return %arg0, %c0_i32, %c0_i32_0 : i32, i32, i32
  }
  func.func @transform_2(%arg0: i32, %arg1: i32) -> (i32, i32, i32) {
    %c0_i32 = arith.constant 0 : i32
    %c0_i32_0 = arith.constant 0 : i32
    %c0_i32_1 = arith.constant 0 : i32
    return %arg0, %c0_i32, %c0_i32_0 : i32, i32, i32
  }
  func.func @transform_3(%arg0: i32, %arg1: i32) -> (i32, i32, i32) {
    %c0_i32 = arith.constant 0 : i32
    %c0_i32_0 = arith.constant 0 : i32
    %c0_i32_1 = arith.constant 0 : i32
    return %arg0, %c0_i32, %c0_i32_0 : i32, i32, i32
  }
  func.func @transform_4(%arg0: i32, %arg1: i32) -> (i32, i32, i32) {
    %c0_i32 = arith.constant 0 : i32
    %c0_i32_0 = arith.constant 0 : i32
    return %arg0, %arg1, %c0_i32 : i32, i32, i32
  }
  func.func @transform_5(%arg0: i32, %arg1: i32) -> (i32, i32, i32, i32) {
    %c0_i32 = arith.constant 0 : i32
    %c0_i32_0 = arith.constant 0 : i32
    %c0_i32_1 = arith.constant 0 : i32
    return %arg0, %c0_i32, %arg1, %c0_i32_0 : i32, i32, i32, i32
  }
}

module attributes {stable_mosaic.version = 11 : i64} {
  func.func @kernel(%arg0: i32, %arg1: memref<16x32xf32, #tpu.memory_space<vmem>>, %arg2: memref<32x64xbf16, #tpu.memory_space<vmem>>, %arg3: memref<1x64xf32, #tpu.memory_space<vmem>>, %arg4: memref<16x32xbf16, #tpu.memory_space<vmem>>, %arg5: memref<16x32xbf16, #tpu.memory_space<vmem>>) attributes {dimension_semantics = [#tpu.dimension_semantics<parallel>], iteration_bounds = array<i64: 1>, scalar_prefetch = 0 : i64, scratch_operands = 0 : i64, tpu.core_type = #tpu.core_type<tc>, window_params = [{transform_indices = @transform_0, window_bounds = array<i64: 16, 32>}, {pipeline_mode = #tpu.pipeline_mode<synchronous>, transform_indices = @transform_1, window_bounds = array<i64: 32, 64>}, {pipeline_mode = #tpu.pipeline_mode<synchronous>, transform_indices = @transform_2, window_bounds = array<i64: 1, 64>}, {transform_indices = @transform_3, window_bounds = array<i64: 16, 32>}, {transform_indices = @transform_4, window_bounds = array<i64: 16, 32>}]} {
    %c0 = arith.constant 0 : index
    %c0_0 = arith.constant 0 : index
    %0 = vector.load %arg1[%c0, %c0_0] : memref<16x32xf32, #tpu.memory_space<vmem>>, vector<16x32xf32>
    %1 = arith.truncf %0 : vector<16x32xf32> to vector<16x32xbf16>
    %c0_1 = arith.constant 0 : index
    %c0_2 = arith.constant 0 : index
    %2 = vector.load %arg2[%c0_1, %c0_2] : memref<32x64xbf16, #tpu.memory_space<vmem>>, vector<32x64xbf16>
    %cst = arith.constant dense<0.000000e+00> : vector<16x64xf32>
    %3 = tpu.matmul %1, %2, %cst {dimension_numbers = #tpu.dot_dimension_numbers<[1], [0], [0], [1], [0, 0, 1, 1], [], []>} : vector<16x32xbf16>, vector<32x64xbf16>, vector<16x64xf32> -> vector<16x64xf32>
    %c0_3 = arith.constant 0 : index
    %c0_4 = arith.constant 0 : index
    %4 = vector.load %arg3[%c0_3, %c0_4] : memref<1x64xf32, #tpu.memory_space<vmem>>, vector<1x64xf32>
    %5 = vector.broadcast %4 : vector<1x64xf32> to vector<16x64xf32>
    %6 = arith.addf %3, %5 : vector<16x64xf32>
    %7 = vector.extract_strided_slice %6 {offsets = [0, 0], sizes = [16, 32], strides = [1, 1]} : vector<16x64xf32> to vector<16x32xf32>
    %8 = arith.truncf %7 : vector<16x32xf32> to vector<16x32xbf16>
    %c0_5 = arith.constant 0 : index
    %c0_6 = arith.constant 0 : index
    %9 = vector.load %arg4[%c0_5, %c0_6] : memref<16x32xbf16, #tpu.memory_space<vmem>>, vector<16x32xbf16>
    tpu.vector_store %arg4[%c0_5, %c0_6], %8 {strides = array<i32>} : memref<16x32xbf16, #tpu.memory_space<vmem>>, vector<16x32xbf16>,
    %10 = vector.extract_strided_slice %6 {offsets = [0, 32], sizes = [16, 32], strides = [1, 1]} : vector<16x64xf32> to vector<16x32xf32>
    %11 = arith.truncf %10 : vector<16x32xf32> to vector<16x32xbf16>
    %c0_7 = arith.constant 0 : index
    %c0_8 = arith.constant 0 : index
    %12 = vector.load %arg5[%c0_7, %c0_8] : memref<16x32xbf16, #tpu.memory_space<vmem>>, vector<16x32xbf16>
    tpu.vector_store %arg5[%c0_7, %c0_8], %11 {strides = array<i32>} : memref<16x32xbf16, #tpu.memory_space<vmem>>, vector<16x32xbf16>,
    return
  }
  func.func @transform_0(%arg0: i32) -> (i32, i32) {
    %c0_i32 = arith.constant 0 : i32
    %c0_i32_0 = arith.constant 0 : i32
    return %arg0, %c0_i32 : i32, i32
  }
  func.func @transform_1(%arg0: i32) -> (i32, i32) {
    %c0_i32 = arith.constant 0 : i32
    %c0_i32_0 = arith.constant 0 : i32
    %c0_i32_1 = arith.constant 0 : i32
    return %c0_i32, %c0_i32_0 : i32, i32
  }
  func.func @transform_2(%arg0: i32) -> (i32, i32) {
    %c0_i32 = arith.constant 0 : i32
    %c0_i32_0 = arith.constant 0 : i32
    %c0_i32_1 = arith.constant 0 : i32
    return %c0_i32, %c0_i32_0 : i32, i32
  }
  func.func @transform_3(%arg0: i32) -> (i32, i32) {
    %c0_i32 = arith.constant 0 : i32
    %c0_i32_0 = arith.constant 0 : i32
    return %arg0, %c0_i32 : i32, i32
  }
  func.func @transform_4(%arg0: i32) -> (i32, i32) {
    %c0_i32 = arith.constant 0 : i32
    %c0_i32_0 = arith.constant 0 : i32
    return %arg0, %c0_i32 : i32, i32
  }
}

module attributes {stable_mosaic.version = 11 : i64} {
  func.func @kernel(%arg0: i32, %arg1: memref<16x32xf32, #tpu.memory_space<vmem>>, %arg2: memref<32x64xbf16, #tpu.memory_space<vmem>>, %arg3: memref<1x64xf32, #tpu.memory_space<vmem>>, %arg4: memref<64x32xbf16, #tpu.memory_space<vmem>>, %arg5: memref<1x32xf32, #tpu.memory_space<vmem>>, %arg6: memref<1x32xf32, #tpu.memory_space<vmem>>, %arg7: memref<1x32xf32, #tpu.memory_space<vmem>>, %arg8: memref<16x32xf32, #tpu.memory_space<vmem>>) attributes {dimension_semantics = [#tpu.dimension_semantics<parallel>], iteration_bounds = array<i64: 1>, scalar_prefetch = 0 : i64, scratch_operands = 0 : i64, tpu.core_type = #tpu.core_type<tc>, window_params = [{transform_indices = @transform_0, window_bounds = array<i64: 16, 32>}, {pipeline_mode = #tpu.pipeline_mode<synchronous>, transform_indices = @transform_1, window_bounds = array<i64: 32, 64>}, {pipeline_mode = #tpu.pipeline_mode<synchronous>, transform_indices = @transform_2, window_bounds = array<i64: 1, 64>}, {pipeline_mode = #tpu.pipeline_mode<synchronous>, transform_indices = @transform_3, window_bounds = array<i64: 64, 32>}, {pipeline_mode = #tpu.pipeline_mode<synchronous>, transform_indices = @transform_4, window_bounds = array<i64: 1, 32>}, {pipeline_mode = #tpu.pipeline_mode<synchronous>, transform_indices = @transform_5, window_bounds = array<i64: 1, 32>}, {pipeline_mode = #tpu.pipeline_mode<synchronous>, transform_indices = @transform_6, window_bounds = array<i64: 1, 32>}, {transform_indices = @transform_7, window_bounds = array<i64: 16, 32>}]} {
    %c0 = arith.constant 0 : index
    %c0_0 = arith.constant 0 : index
    %0 = vector.load %arg1[%c0, %c0_0] : memref<16x32xf32, #tpu.memory_space<vmem>>, vector<16x32xf32>
    %1 = arith.truncf %0 : vector<16x32xf32> to vector<16x32xbf16>
    %c0_1 = arith.constant 0 : index
    %c0_2 = arith.constant 0 : index
    %2 = vector.load %arg2[%c0_1, %c0_2] : memref<32x64xbf16, #tpu.memory_space<vmem>>, vector<32x64xbf16>
    %cst = arith.constant dense<0.000000e+00> : vector<16x64xf32>
    %3 = tpu.matmul %1, %2, %cst {dimension_numbers = #tpu.dot_dimension_numbers<[1], [0], [0], [1], [0, 0, 1, 1], [], []>} : vector<16x32xbf16>, vector<32x64xbf16>, vector<16x64xf32> -> vector<16x64xf32>
    %c0_3 = arith.constant 0 : index
    %c0_4 = arith.constant 0 : index
    %4 = vector.load %arg3[%c0_3, %c0_4] : memref<1x64xf32, #tpu.memory_space<vmem>>, vector<1x64xf32>
    %5 = vector.broadcast %4 : vector<1x64xf32> to vector<16x64xf32>
    %6 = arith.addf %3, %5 : vector<16x64xf32>
    %cst_5 = arith.constant 5.000000e-01 : f32
    %7 = vector.broadcast %cst_5 : f32 to vector<16x64xf32>
    %8 = arith.mulf %7, %6 : vector<16x64xf32>
    %cst_6 = arith.constant 0.707106769 : f32
    %9 = vector.broadcast %cst_6 : f32 to vector<16x64xf32>
    %10 = arith.mulf %6, %9 : vector<16x64xf32>
    %cst_7 = arith.constant 0.000000e+00 : f32
    %11 = vector.broadcast %cst_7 : f32 to vector<16x64xf32>
    %12 = arith.cmpf oge, %10, %11 : vector<16x64xf32>
    %cst_8 = arith.constant 1.000000e+00 : f32
    %cst_9 = arith.constant -1.000000e+00 : f32
    %13 = vector.broadcast %cst_8 : f32 to vector<16x64xf32>
    %14 = vector.broadcast %cst_9 : f32 to vector<16x64xf32>
    %15 = arith.select %12, %13, %14 : vector<16x64xi1>, vector<16x64xf32>
    %16 = math.absf %10 : vector<16x64xf32>
    %cst_10 = arith.constant 0.327591091 : f32
    %17 = vector.broadcast %cst_10 : f32 to vector<16x64xf32>
    %18 = arith.mulf %17, %16 : vector<16x64xf32>
    %cst_11 = arith.constant 1.000000e+00 : f32
    %19 = vector.broadcast %cst_11 : f32 to vector<16x64xf32>
    %20 = arith.addf %19, %18 : vector<16x64xf32>
    %cst_12 = arith.constant 1.000000e+00 : f32
    %21 = vector.broadcast %cst_12 : f32 to vector<16x64xf32>
    %22 = arith.divf %21, %20 : vector<16x64xf32>
    %cst_13 = arith.constant 1.06140542 : f32
    %23 = vector.broadcast %cst_13 : f32 to vector<16x64xf32>
    %24 = arith.mulf %23, %22 : vector<16x64xf32>
    %cst_14 = arith.constant -1.45315206 : f32
    %25 = vector.broadcast %cst_14 : f32 to vector<16x64xf32>
    %26 = arith.addf %24, %25 : vector<16x64xf32>
    %27 = arith.mulf %26, %22 : vector<16x64xf32>
    %cst_15 = arith.constant 1.42141378 : f32
    %28 = vector.broadcast %cst_15 : f32 to vector<16x64xf32>
    %29 = arith.addf %27, %28 : vector<16x64xf32>
    %30 = arith.mulf %29, %22 : vector<16x64xf32>
    %cst_16 = arith.constant -0.284496725 : f32
    %31 = vector.broadcast %cst_16 : f32 to vector<16x64xf32>
    %32 = arith.addf %30, %31 : vector<16x64xf32>
    %33 = arith.mulf %32, %22 : vector<16x64xf32>
    %cst_17 = arith.constant 0.254829586 : f32
    %34 = vector.broadcast %cst_17 : f32 to vector<16x64xf32>
    %35 = arith.addf %33, %34 : vector<16x64xf32>
    %36 = arith.mulf %35, %22 : vector<16x64xf32>
    %cst_18 = arith.constant 0.000000e+00 : f32
    %37 = vector.broadcast %cst_18 : f32 to vector<16x64xf32>
    %38 = arith.subf %37, %16 : vector<16x64xf32>
    %39 = arith.mulf %38, %16 : vector<16x64xf32>
    %40 = math.exp %39 : vector<16x64xf32>
    %41 = arith.mulf %36, %40 : vector<16x64xf32>
    %cst_19 = arith.constant 1.000000e+00 : f32
    %42 = vector.broadcast %cst_19 : f32 to vector<16x64xf32>
    %43 = arith.subf %42, %41 : vector<16x64xf32>
    %44 = arith.mulf %15, %43 : vector<16x64xf32>
    %cst_20 = arith.constant 1.000000e+00 : f32
    %45 = vector.broadcast %cst_20 : f32 to vector<16x64xf32>
    %46 = arith.addf %45, %44 : vector<16x64xf32>
    %47 = arith.mulf %8, %46 : vector<16x64xf32>
    %48 = arith.truncf %47 : vector<16x64xf32> to vector<16x64xbf16>
    %c0_21 = arith.constant 0 : index
    %c0_22 = arith.constant 0 : index
    %49 = vector.load %arg4[%c0_21, %c0_22] : memref<64x32xbf16, #tpu.memory_space<vmem>>, vector<64x32xbf16>
    %cst_23 = arith.constant dense<0.000000e+00> : vector<16x32xf32>
    %50 = tpu.matmul %48, %49, %cst_23 {dimension_numbers = #tpu.dot_dimension_numbers<[1], [0], [0], [1], [0, 0, 1, 1], [], []>} : vector<16x64xbf16>, vector<64x32xbf16>, vector<16x32xf32> -> vector<16x32xf32>
    %c0_24 = arith.constant 0 : index
    %c0_25 = arith.constant 0 : index
    %51 = vector.load %arg5[%c0_24, %c0_25] : memref<1x32xf32, #tpu.memory_space<vmem>>, vector<1x32xf32>
    %52 = vector.broadcast %51 : vector<1x32xf32> to vector<16x32xf32>
    %53 = arith.addf %50, %52 : vector<16x32xf32>
    %54 = arith.addf %0, %53 : vector<16x32xf32>
    %c0_26 = arith.constant 0 : index
    %c0_27 = arith.constant 0 : index
    %55 = vector.load %arg6[%c0_26, %c0_27] : memref<1x32xf32, #tpu.memory_space<vmem>>, vector<1x32xf32>
    %c0_28 = arith.constant 0 : index
    %c0_29 = arith.constant 0 : index
    %56 = vector.load %arg7[%c0_28, %c0_29] : memref<1x32xf32, #tpu.memory_space<vmem>>, vector<1x32xf32>
    %cst_30 = arith.constant dense<0.000000e+00> : vector<16xf32>
    %57 = vector.multi_reduction <add>, %54, %cst_30 [1] : vector<16x32xf32> to vector<16xf32>
    %58 = vector.shape_cast %57 : vector<16xf32> to vector<16x1xf32>
    %cst_31 = arith.constant 3.200000e+01 : f32
    %59 = vector.broadcast %cst_31 : f32 to vector<16x1xf32>
    %60 = arith.divf %58, %59 : vector<16x1xf32>
    %61 = vector.broadcast %60 : vector<16x1xf32> to vector<16x32xf32>
    %62 = arith.subf %54, %61 : vector<16x32xf32>
    %63 = arith.mulf %62, %62 : vector<16x32xf32>
    %cst_32 = arith.constant dense<0.000000e+00> : vector<16xf32>
    %64 = vector.multi_reduction <add>, %63, %cst_32 [1] : vector<16x32xf32> to vector<16xf32>
    %65 = vector.shape_cast %64 : vector<16xf32> to vector<16x1xf32>
    %cst_33 = arith.constant 3.200000e+01 : f32
    %66 = vector.broadcast %cst_33 : f32 to vector<16x1xf32>
    %67 = arith.divf %65, %66 : vector<16x1xf32>
    %cst_34 = arith.constant 9.99999996E-13 : f32
    %68 = vector.broadcast %cst_34 : f32 to vector<16x1xf32>
    %69 = arith.addf %67, %68 : vector<16x1xf32>
    %70 = math.rsqrt %69 : vector<16x1xf32>
    %71 = vector.broadcast %70 : vector<16x1xf32> to vector<16x32xf32>
    %72 = arith.mulf %62, %71 : vector<16x32xf32>
    %73 = vector.broadcast %55 : vector<1x32xf32> to vector<16x32xf32>
    %74 = arith.mulf %72, %73 : vector<16x32xf32>
    %75 = vector.broadcast %56 : vector<1x32xf32> to vector<16x32xf32>
    %76 = arith.addf %74, %75 : vector<16x32xf32>
    %c0_35 = arith.constant 0 : index
    %c0_36 = arith.constant 0 : index
    %77 = vector.load %arg8[%c0_35, %c0_36] : memref<16x32xf32, #tpu.memory_space<vmem>>, vector<16x32xf32>
    tpu.vector_store %arg8[%c0_35, %c0_36], %76 {strides = array<i32>} : memref<16x32xf32, #tpu.memory_space<vmem>>, vector<16x32xf32>,
    return
  }
  func.func @transform_0(%arg0: i32) -> (i32, i32) {
    %c0_i32 = arith.constant 0 : i32
    %c0_i32_0 = arith.constant 0 : i32
    return %arg0, %c0_i32 : i32, i32
  }
  func.func @transform_1(%arg0: i32) -> (i32, i32) {
    %c0_i32 = arith.constant 0 : i32
    %c0_i32_0 = arith.constant 0 : i32
    %c0_i32_1 = arith.constant 0 : i32
    return %c0_i32, %c0_i32_0 : i32, i32
  }
  func.func @transform_2(%arg0: i32) -> (i32, i32) {
    %c0_i32 = arith.constant 0 : i32
    %c0_i32_0 = arith.constant 0 : i32
    %c0_i32_1 = arith.constant 0 : i32
    return %c0_i32, %c0_i32_0 : i32, i32
  }
  func.func @transform_3(%arg0: i32) -> (i32, i32) {
    %c0_i32 = arith.constant 0 : i32
    %c0_i32_0 = arith.constant 0 : i32
    %c0_i32_1 = arith.constant 0 : i32
    return %c0_i32, %c0_i32_0 : i32, i32
  }
  func.func @transform_4(%arg0: i32) -> (i32, i32) {
    %c0_i32 = arith.constant 0 : i32
    %c0_i32_0 = arith.constant 0 : i32
    %c0_i32_1 = arith.constant 0 : i32
    return %c0_i32, %c0_i32_0 : i32, i32
  }
  func.func @transform_5(%arg0: i32) -> (i32, i32) {
    %c0_i32 = arith.constant 0 : i32
    %c0_i32_0 = arith.constant 0 : i32
    %c0_i32_1 = arith.constant 0 : i32
    return %c0_i32, %c0_i32_0 : i32, i32
  }
  func.func @transform_6(%arg0: i32) -> (i32, i32) {
    %c0_i32 = arith.constant 0 : i32
    %c0_i32_0 = arith.constant 0 : i32
    %c0_i32_1 = arith.constant 0 : i32
    return %c0_i32, %c0_i32_0 : i32, i32
  }
  func.func @transform_7(%arg0: i32) -> (i32, i32) {
    %c0_i32 = arith.constant 0 : i32
    %c0_i32_0 = arith.constant 0 : i32
    return %arg0, %c0_i32 : i32, i32
  }
}

module attributes {stable_mosaic.version = 11 : i64} {
  func.func @kernel(%arg0: i32, %arg1: memref<16x32xf32, #tpu.memory_space<vmem>>, %arg2: memref<32x32xbf16, #tpu.memory_space<vmem>>, %arg3: memref<1x32xf32, #tpu.memory_space<vmem>>, %arg4: memref<16x32xbf16, #tpu.memory_space<vmem>>) attributes {dimension_semantics = [#tpu.dimension_semantics<parallel>], iteration_bounds = array<i64: 1>, scalar_prefetch = 0 : i64, scratch_operands = 0 : i64, tpu.core_type = #tpu.core_type<tc>, window_params = [{transform_indices = @transform_0, window_bounds = array<i64: 16, 32>}, {pipeline_mode = #tpu.pipeline_mode<synchronous>, transform_indices = @transform_1, window_bounds = array<i64: 32, 32>}, {pipeline_mode = #tpu.pipeline_mode<synchronous>, transform_indices = @transform_2, window_bounds = array<i64: 1, 32>}, {transform_indices = @transform_3, window_bounds = array<i64: 16, 32>}]} {
    %c0 = arith.constant 0 : index
    %c0_0 = arith.constant 0 : index
    %0 = vector.load %arg1[%c0, %c0_0] : memref<16x32xf32, #tpu.memory_space<vmem>>, vector<16x32xf32>
    %1 = arith.truncf %0 : vector<16x32xf32> to vector<16x32xbf16>
    %c0_1 = arith.constant 0 : index
    %c0_2 = arith.constant 0 : index
    %2 = vector.load %arg2[%c0_1, %c0_2] : memref<32x32xbf16, #tpu.memory_space<vmem>>, vector<32x32xbf16>
    %cst = arith.constant dense<0.000000e+00> : vector<16x32xf32>
    %3 = tpu.matmul %1, %2, %cst {dimension_numbers = #tpu.dot_dimension_numbers<[1], [0], [0], [1], [0, 0, 1, 1], [], []>} : vector<16x32xbf16>, vector<32x32xbf16>, vector<16x32xf32> -> vector<16x32xf32>
    %c0_3 = arith.constant 0 : index
    %c0_4 = arith.constant 0 : index
    %4 = vector.load %arg3[%c0_3, %c0_4] : memref<1x32xf32, #tpu.memory_space<vmem>>, vector<1x32xf32>
    %5 = vector.broadcast %4 : vector<1x32xf32> to vector<16x32xf32>
    %6 = arith.addf %3, %5 : vector<16x32xf32>
    %7 = arith.truncf %6 : vector<16x32xf32> to vector<16x32xbf16>
    %c0_5 = arith.constant 0 : index
    %c0_6 = arith.constant 0 : index
    %8 = vector.load %arg4[%c0_5, %c0_6] : memref<16x32xbf16, #tpu.memory_space<vmem>>, vector<16x32xbf16>
    tpu.vector_store %arg4[%c0_5, %c0_6], %7 {strides = array<i32>} : memref<16x32xbf16, #tpu.memory_space<vmem>>, vector<16x32xbf16>,
    return
  }
  func.func @transform_0(%arg0: i32) -> (i32, i32) {
    %c0_i32 = arith.constant 0 : i32
    %c0_i32_0 = arith.constant 0 : i32
    return %arg0, %c0_i32 : i32, i32
  }
  func.func @transform_1(%arg0: i32) -> (i32, i32) {
    %c0_i32 = arith.constant 0 : i32
    %c0_i32_0 = arith.constant 0 : i32
    %c0_i32_1 = arith.constant 0 : i32
    return %c0_i32, %c0_i32_0 : i32, i32
  }
  func.func @transform_2(%arg0: i32) -> (i32, i32) {
    %c0_i32 = arith.constant 0 : i32
    %c0_i32_0 = arith.constant 0 : i32
    %c0_i32_1 = arith.constant 0 : i32
    return %c0_i32, %c0_i32_0 : i32, i32
  }
  func.func @transform_3(%arg0: i32) -> (i32, i32) {
    %c0_i32 = arith.constant 0 : i32
    %c0_i32_0 = arith.constant 0 : i32
    return %arg0, %c0_i32 : i32, i32
  }
}

</mosaic_0001>

<bundles_post_ra>
// kernel: tpu_custom_call.1
= control target key start
LH: loop header
LB: loop body
LE: loop exit
PB: predicated region body
PF: predicated region fallthrough
CT: control target
= control target key end

     0   :  { %6 = vsyncpa [#allocation3], 0  ;;  %s481_s0 = inlined_call_operand.hbm [shape: f32[8,128], index: 0, kind: input, shape index: {}]   ;;  %s482_s1 = inlined_call_operand.hbm [shape: f32[16,128], index: 1, kind: output, shape index: {}]  }
   0x1   :  { %7 = vsyncpa [#allocation4], 0 }
   0x2   :  { %9 = vsyncpa [#allocation4 + $0x1], 0  ;;  %s351_s6 = smov 0   ;;  %s353_s7 = smov 0  }
   0x3   :  { %s355_s8 = smov 0   ;;  %s357_s9 = smov 0  }
   0x4 LB: > { %s372_s10 = sadd.s32 4294967295, %s337_s9   ;;  %s183_s11 = sadd.s32 4294967294, %s337_s9   ;;  %s337_s9 = sphi %s357_s9, %s498_s9   ;;  %s333_s8 = sphi %s355_s8, %s497_s8   ;;  %s329_s7 = sphi %s353_s7, %s496_s7   ;;  %s325_s6 = sphi %s351_s6, %s495_s6  }
   0x5   : > { %s376_s12 = sadd.s32 1, %s337_s9   ;;  %s43_s13 = sadd.s32 1, %s333_s8 }
   0x6   : > { %s40_s14 = ssub.s32 %s337_s9, %s376_s12  ;;  %p53_p0 = scmp.ne.s32.totalorder %s333_s8, %s329_s7 }
   0x7   : > { %p41_p1 = scmp.eq.s32.totalorder %s40_s14, 0  ;;  %p54_p2 = scmp.eq.s32.totalorder %s372_s10, 1 }
   0x8   : > { %p59_p3 = scmp.ne.s32.totalorder %s329_s7, %s325_s6  ;;  %p60_p4 = scmp.eq.s32.totalorder %s183_s11, 1 }
   0x9   : > { %s387_s15 = scalar_select %p41_p1, %s333_s8, %s43_s13  }
   0xa   : > { %p389_p5 = por %p54_p2, %p53_p0  ;;  %p393_p6 = por %p60_p4, %p59_p3 }
   0xb   : > { %p184_p7 = scmp.ge.s32.totalorder %s337_s9, 1  ;;  %p67_p8 = scmp.lt.s32.totalorder %s337_s9, 3 }
   0xc   : > { %s486_s16 = scalar_select %p389_p5, 1, 0 }
   0xd   : > { %s487_s17 = scalar_select %p393_p6, 1, 0 }
   0xe   : > { %p483_p9 = scmp.eq.s32.totalorder %s372_s10, 0  ;;  %p400_p10 = pnand %p184_p7, %p67_p8 }
   0xf   : > { %s339_s19 = smov [#allocation2]   ;;  %s243_s24 = scalar_lea.hbm %s481_s0, 128 }
  0x10   : > { %s488_s18 = scalar_select %p400_p10, 1, 0 }
  0x11   : > { %s80_s20 = sshll.u32 %s339_s19, 4  ;;  %p199_p11 = pneg %p400_p10  ;;  %s81_s20 = int_to_ptr.vmem [resolvable:$true] %s80_s20 }
  0x12   : > { %p244_p13 = scmp.ne.s32.totalorder %s481_s0, %s243_s24  ;;  %p250_p3 = scmp.lt.u32.totalorder %s243_s24, %s481_s0 }
  0x13   : > { %p408_p12 = pnand %p483_p9, %p199_p11 }
  0x15   : > { %p245_p0 = pneg %p408_p12 }
  0x17   : > { %p246_p1 = pnand %p245_p0, %p244_p13 }
  0x19   : > { %p247_p2 = pneg %p246_p1 }
  0x1b   : > { %p252_p4 = pnand %p250_p3, %p247_p2 }
  0x1d   : > { %255 = shalt.err (!%p252_p4)
}
  0x1e   : > { %s256_s29 = scalar_lea.vmem %s81_s20, 128  ;;  %p264_p9 = scmp.lt.s32.totalorder %s81_s20, %s81_s20 }
  0x1f   : > { %p257_p7 = scmp.ne.s32.totalorder %s81_s20, %s256_s29  ;;  %p265_p6 = scmp.lt.s32.totalorder %s256_s29, %s256_s29 }
  0x21   : > { %p259_p8 = pnand %p257_p7, %p245_p0  ;;  %p266_p5 = por %p265_p6, %p264_p9 }
  0x23   : > { %p260_p11 = pneg %p259_p8 }
  0x25   : > { %p267_p10 = pnand %p266_p5, %p260_p11 }
  0x27   : > { %270 = shalt.err (!%p267_p10)
}
  0x28   : > { %202 = dma.hbm_to_vmem [thread:$0]  (!%p408_p12), %s481_s0, 128, %s81_s20, [#allocation3]  }
  0x29   : > { %p490_p13 = scmp.ne.s32.totalorder %s488_s18, 0 }
  0x2a   : > { %p491_p1 = scmp.eq.s32.totalorder (!%p490_p13), %s372_s10, 0 }
  0x2b   : > { %93 = sbr.rel (%p490_p13) target bundleno = 77 (0x4d), region = 24 }
  0x32   : > { %316 = dma.done.wait (%p491_p1), [#allocation3], 128   ;;  %p492_p0 = pmov %p491_p1 }
  0x33   : > { %s105_s3 = sand.u32 1, %s329_s7   ;;  %s190_s13 = sshll.u32 %s372_s10, 7  ;;  %v108_v0 = vld [vmem:[#allocation2] sm:$0xff] }
  0x34   : > { %318 = vsyncadd (%p492_p0), [#allocation3], 4294967168  ;;  %s188_s4 = sshll.u32 %s105_s3, 3  ;;  %s441_s18 = scalar_lea.hbm %s482_s1, %s190_s13 }
  0x35   : > { %s107_s5 = scalar_lea.vmem [#allocation5], %s188_s4  ;;  %s111_s20 = scalar_lea.sflag [#allocation4], %s105_s3 }
  0x36   : > { %s124_s11 = sshll.u32 %s107_s5, 4  ;;  %109 = vst [vmem:[%s107_s5] sm:$0xff] %v108_v0  ;;  %p493_p6 = scmp.ne.s32.totalorder %s486_s16, 0  ;;  %s436_s11 = int_to_ptr.vmem [resolvable:$true] %s124_s11 }
  0x37   : > { %s271_s21 = scalar_lea.vmem %s436_s11, 128  ;;  %s340_s22 = smov [#allocation5]  }
  0x38   : > { %p272_p5 = scmp.ne.s32.totalorder %s436_s11, %s271_s21  ;;  %s275_s10 = sshll.u32 %s340_s22, 4  ;;  %s276_s10 = int_to_ptr.vmem [resolvable:$false] %s275_s10 }
  0x39   : > { %s277_s23 = scalar_lea.vmem %s276_s10, 256  ;;  %p278_p12 = scmp.lt.s32.totalorder %s436_s11, %s276_s10 }
  0x3a   : > { %p273_p9 = pnand %p272_p5, %p493_p6  ;;  %p279_p2 = scmp.lt.s32.totalorder %s277_s23, %s271_s21 }
  0x3c   : > { %p274_p10 = pneg %p273_p9  ;;  %p280_p3 = por %p279_p2, %p278_p12 }
  0x3e   : > { %p281_p4 = pnand %p280_p3, %p274_p10 }
  0x40   : > { %284 = shalt.err (!%p281_p4)
}
  0x41   : > { %s285_s24 = scalar_lea.hbm %s441_s18, 128  ;;  %s289_s27 = scalar_lea.hbm %s482_s1, 256 }
  0x42   : > { %p286_p7 = scmp.ne.s32.totalorder %s441_s18, %s285_s24  ;;  %p290_p13 = scmp.lt.u32.totalorder %s441_s18, %s482_s1 }
  0x43   : > { %p291_p1 = scmp.lt.u32.totalorder %s289_s27, %s285_s24  ;;  %p293_p5 = scmp.lt.u32.totalorder %s285_s24, %s441_s18 }
  0x44   : > { %p287_p8 = pnand %p286_p7, %p493_p6 }
  0x45   : > { %p292_p0 = por %p291_p1, %p290_p13 }
  0x46   : > { %p288_p11 = pneg %p287_p8 }
  0x47   : > { %p294_p9 = por %p293_p5, %p292_p0 }
  0x49   : > { %p295_p10 = pnand %p294_p9, %p288_p11 }
  0x4b   : > { %298 = shalt.err (!%p295_p10)
}
  0x4c   : > { %197 = dma.vmem_to_hbm [thread:$0]  (%p493_p6), %s436_s11, 128, %s441_s18, %s111_s20  }
  0x4d PF: > { %p209_p12 = scmp.ge.s32.totalorder %s337_s9, 2  ;;  %s136_s30 = sand.u32 1, %s325_s6  }
  0x4e   : > { %p494_p2 = scmp.ne.s32.totalorder %s487_s17, 0  ;;  %s137_s2 = scalar_lea.sflag [#allocation4], %s136_s30 }
  0x50   : > { %p204_p3 = pnand %p209_p12, %p494_p2 }
  0x52   : > { %320 = dma.done.wait (!%p204_p3), %s137_s2, 128  }
  0x53   : > { %322 = vsyncadd (!%p204_p3), %s137_s2, 4294967168  ;;  %p12_p4 = scmp.ge.s32.totalorder %s376_s12, 4   ;;  %s495_s6 = smov %s329_s7 }
  0x54   : > { %s496_s7 = smov %s333_s8  ;;  %s497_s8 = smov %s387_s15 }
  0x55   : > { %s498_s9 = smov %s376_s12  ;;  %14 = sbr.rel (!%p12_p4) target bundleno = 4 (0x4), region = 61 }
  0x5c   :  { %142 = vsyncpa [#allocation3], 1 }
  0x5d   :  { %144 = vsyncpa [#allocation3 + $0x1], 1 }
  0x5e   :  { %145 = vsyncpa [#allocation4], 1 }
  0x5f   :  { %147 = vsyncpa [#allocation4 + $0x1], 1 }

// kernel: transformer_layer_forward.12
= control target key start
LH: loop header
LB: loop body
LE: loop exit
PB: predicated region body
PF: predicated region fallthrough
CT: control target
= control target key end

     0   :  { %v153_v0 = vmov 0.0   ;;  %vm154_vm0 = vmmov 0   ;;  %vm44_vm1 = vcmask 261120   ;;  %vm97_vm2 = vcmask 257024   ;;  %s155_s28 = smov 64   ;;  %s156_s29 = smov 96   ;;  %s226_s1 = inlined_call_operand.vmem [shape: bf16[32,96], index: 1, kind: input, shape index: {}]   ;;  %s227_s0 = inlined_call_operand.vmem [shape: f32[16,32], index: 0, kind: input, shape index: {}]   ;;  %s228_s2 = inlined_call_operand.vmem [shape: f32[1,96], index: 2, kind: input, shape index: {}]   ;;  %s229_s3 = inlined_call_operand.vmem [shape: bf16[16,32], index: 3, kind: output, shape index: {0}]   ;;  %s230_s5 = inlined_call_operand.vmem [shape: bf16[16,32], index: 5, kind: output, shape index: {2}]   ;;  %s231_s4 = inlined_call_operand.vmem [shape: bf16[16,32], index: 4, kind: output, shape index: {1}]  }
   0x1   :  { %139 = vmatprep.subr.bf16.mxu0 %v153_v0  ;;  %v151_v1 = vld [vmem:[%s226_s1] sm:$0xff]   ;;  %143 = vmatprep.mubr.msk.bf16.mxu0 %vm154_vm0, %v153_v0  ;;  %v152_v2 = vld [vmem:[%s226_s1 + $0x8] sm:$0xff]  }
   0x2   :  { %140 = vmatpush3.bf16.msra.mxu0 %v151_v1  ;;  %v18_v3 = vld [vmem:[%s227_s0] sm:$0xff]  ;;  %v19_v4 = vld [vmem:[%s227_s0 + $0x8] sm:$0xff] }
   0x3   :  { %141 = vmatprep.subr.bf16.mxu0 %v153_v0  ;;  %v20_v5 = vpack.c.bf16 %v19_v4, %v18_v3  ;;  %v128_v6 = vld [vmem:[%s228_s2] ss:$0 sm:$0xff] }
   0x6   :  { %142 = vmatpush3.bf16.msra.mxu0 %v152_v2 }
   0x9   :  { %144 = vmatmul.mubr.msk.bf16.vlgmr.msra.gmra.mrb[0].mxu0 %vm44_vm1, %v20_v5 }
  0xdc   :  { %v82_v7 = vpop.f32.mrb[0].mxu0 }
  0xdd   :  { %v83_v8 = vadd.f32 %v128_v6, %v82_v7  ;;  %v145_v9 = vpop.f32.mrb[1].mxu0 }
  0xde   :  { %v85_v10 = vpop.f32.mrb[2].mxu0 }
  0xdf   :  { %v134_v11 = vpack.c.bf16 %v83_v8, %v83_v8  ;;  %v86_v12 = vadd.f32 %v128_v6, %v85_v10  ;;  %v146_v13 = vpop.f32.mrb[3].mxu0 }
  0xe1   :  { %98 = vst.msk [vmem:[%s229_s3] sm:$0xf] %vm97_vm2, %v134_v11  ;;  %v135_v14 = vpack.c.bf16 %v86_v12, %v86_v12  ;;  %108 = vrot.lane.b32.xlu1 %v134_v11, %s155_s28  ;;  %100 = vrot.lane.b32.xlu0 %v134_v11, %s156_s29 }
  0xe3   :  { %99 = vst.msk [vmem:[%s229_s3 + $0x4] sm:$0xf] %vm97_vm2, %v135_v14 }
  0xe5   :  { %110 = vrot.lane.b32.xlu1 %v135_v14, %s155_s28  ;;  %102 = vrot.lane.b32.xlu0 %v135_v14, %s156_s29 }
 0x153   :  { %v109_v15 = vpop.permute.xlu1 %108  ;;  %v101_v16 = vpop.permute.xlu0 %100 }
 0x154   :  { %114 = vst.msk [vmem:[%s230_s5] sm:$0xf] %vm97_vm2, %v109_v15  ;;  %106 = vst.msk [vmem:[%s231_s4] sm:$0xf] %vm97_vm2, %v101_v16 }
 0x157   :  { %v111_v17 = vpop.permute.xlu1 %110  ;;  %v103_v18 = vpop.permute.xlu0 %102 }
 0x158   :  { %115 = vst.msk [vmem:[%s230_s5 + $0x4] sm:$0xf] %vm97_vm2, %v111_v17  ;;  %107 = vst.msk [vmem:[%s231_s4 + $0x4] sm:$0xf] %vm97_vm2, %v103_v18 }

// kernel: transformer_layer_forward.14
= control target key start
LH: loop header
LB: loop body
LE: loop exit
PB: predicated region body
PF: predicated region fallthrough
CT: control target
= control target key end

     0   :  { %v181_v0 = vmov 0.0   ;;  %vm182_vm0 = vmmov 0   ;;  %vm54_vm1 = vcmask 261120   ;;  %s255_s2 = inlined_call_operand.vmem [shape: bf16[32,32], index: 2, kind: input, shape index: {}]   ;;  %s256_s0 = inlined_call_operand.vmem [shape: bf16[16,32], index: 0, kind: input, shape index: {}]   ;;  %s257_s3 = inlined_call_operand.vmem [shape: f32[1,32], index: 3, kind: input, shape index: {}]   ;;  %s258_s1 = inlined_call_operand.vmem [shape: f32[16,32], index: 1, kind: input, shape index: {}]   ;;  %s259_s4 = inlined_call_operand.vmem [shape: f32[1,32], index: 4, kind: input, shape index: {}]   ;;  %s260_s5 = inlined_call_operand.vmem [shape: f32[1,32], index: 5, kind: input, shape index: {}]   ;;  %s261_s6 = inlined_call_operand.vmem [shape: f32[16,32], index: 6, kind: output, shape index: {}]  }
   0x1   :  { %164 = vmatprep.subr.bf16.mxu0 %v181_v0  ;;  %v174_v1 = vld [vmem:[%s255_s2] sm:$0xff]   ;;  %168 = vmatprep.mubr.msk.bf16.mxu0 %vm182_vm0, %v181_v0  ;;  %v175_v2 = vld [vmem:[%s255_s2 + $0x8] sm:$0xff]  }
   0x2   :  { %165 = vmatpush3.bf16.msra.mxu0 %v174_v1  ;;  %v176_v3 = vld [vmem:[%s256_s0] sm:$0xff]   ;;  %v100_v10 = vld [vmem:[%s258_s1 + $0x8] sm:$0xff] }
   0x3   :  { %166 = vmatprep.subr.bf16.mxu0 %v181_v0  ;;  %v154_v4 = vld [vmem:[%s257_s3] ss:$0 sm:$0xff] }
   0x4   :  { %v99_v6 = vld [vmem:[%s258_s1] sm:$0xff] }
   0x5   :  { %v159_v34 = vld [vmem:[%s259_s4] ss:$0 sm:$0xff] }
   0x6   :  { %167 = vmatpush3.bf16.msra.mxu0 %v175_v2  ;;  %v160_v36 = vld [vmem:[%s260_s5] ss:$0 sm:$0xff] }
   0x9   :  { %169 = vmatmul.mubr.msk.bf16.vlgmr.msra.gmra.mrb[0].mxu0 %vm54_vm1, %v176_v3 }
  0xdc   :  { %v92_v5 = vpop.f32.mrb[0].mxu0 }
  0xdd   :  { %v93_v7 = vadd.f32 %v154_v4, %v92_v5  ;;  %v170_v8 = vpop.f32.mrb[1].mxu0 }
  0xde   :  { %v95_v9 = vpop.f32.mrb[2].mxu0 }
  0xdf   :  { %v96_v11 = vadd.f32 %v154_v4, %v95_v9  ;;  %v171_v12 = vpop.f32.mrb[3].mxu0  ;;  %v101_v13 = vadd.f32 %v99_v6, %v93_v7 }
  0xe1   :  { %v105_v14 = vsel %vm54_vm1, %v101_v13, 0.0  ;;  %v102_v15 = vadd.f32 %v100_v10, %v96_v11 }
  0xe2   :  { %106 = vadd.xlane.f32.xlu0 %v105_v14 }
  0xe3   :  { %v108_v16 = vsel %vm54_vm1, %v102_v15, 0.0 }
  0xe6   :  { %109 = vadd.xlane.f32.xlu0 %v108_v16 }
 0x16f   :  { %v107_v17 = vpop.xlane.xlu0 %106 }
 0x170   :  { %v112_v18 = vmul.f32 0.03125, %v107_v17 }
 0x172   :  { %v114_v19 = vsub.f32 %v101_v13, %v112_v18 }
 0x173   :  { %v110_v20 = vpop.xlane.xlu0 %109 }
 0x174   :  { %v113_v21 = vmul.f32 0.03125, %v110_v20  ;;  %v116_v22 = vmul.f32 %v114_v19, %v114_v19 }
 0x176   :  { %v115_v23 = vsub.f32 %v102_v15, %v113_v21  ;;  %v118_v24 = vsel %vm54_vm1, %v116_v22, 0.0 }
 0x177   :  { %119 = vadd.xlane.f32.xlu1 %v118_v24 }
 0x178   :  { %v117_v25 = vmul.f32 %v115_v23, %v115_v23 }
 0x17a   :  { %v121_v26 = vsel %vm54_vm1, %v117_v25, 0.0 }
 0x17b   :  { %122 = vadd.xlane.f32.xlu1 %v121_v26 }
 0x204   :  { %v120_v27 = vpop.xlane.xlu1 %119 }
 0x205   :  { %v124_v28 = vmul.f32 0.03125, %v120_v27 }
 0x207   :  { %v126_v29 = vadd.f32 1e-12, %v124_v28 }
 0x208   :  { %v123_v30 = vpop.xlane.xlu1 %122 }
 0x209   :  { %177 = vrsqrt.f32 %v126_v29  ;;  %v125_v31 = vmul.f32 0.03125, %v123_v30 }
 0x20b   :  { %v127_v32 = vadd.f32 1e-12, %v125_v31 }
 0x20d   :  { %179 = vrsqrt.f32 %v127_v32 }
 0x213   :  { %v178_v33 = vpop.eup %177 }
 0x214   :  { %v130_v35 = vmul.f32 %v178_v33, %v114_v19 }
 0x216   :  { %v138_v37 = vmul.f32 %v159_v34, %v130_v35 }
 0x217   :  { %v180_v38 = vpop.eup %179 }
 0x218   :  { %v146_v39 = vadd.f32 %v160_v36, %v138_v37  ;;  %v131_v40 = vmul.f32 %v180_v38, %v115_v23 }
 0x21a   :  { %148 = vst.msk [vmem:[%s261_s6] sm:$0xff] %vm54_vm1, %v146_v39  ;;  %v139_v41 = vmul.f32 %v159_v34, %v131_v40 }
 0x21c   :  { %v147_v42 = vadd.f32 %v160_v36, %v139_v41 }
 0x21e   :  { %149 = vst.msk [vmem:[%s261_s6 + $0x8] sm:$0xff] %vm54_vm1, %v147_v42 }

// kernel: transformer_layer_forward.15
= control target key start
LH: loop header
LB: loop body
LE: loop exit
PB: predicated region body
PF: predicated region fallthrough
CT: control target
= control target key end

     0   :  { %v351_v0 = vmov 0.0   ;;  %vm352_vm0 = vmmov 0   ;;  %vm53_vm1 = vcmask 261120   ;;  %v353_v55 = vmov -1.0   ;;  %s451_s1 = inlined_call_operand.vmem [shape: bf16[32,64], index: 1, kind: input, shape index: {}]   ;;  %s452_s0 = inlined_call_operand.vmem [shape: f32[16,32], index: 0, kind: input, shape index: {}]   ;;  %s453_s3 = inlined_call_operand.vmem [shape: bf16[64,32], index: 3, kind: input, shape index: {}]   ;;  %s454_s2 = inlined_call_operand.vmem [shape: f32[1,64], index: 2, kind: input, shape index: {}]   ;;  %s455_s4 = inlined_call_operand.vmem [shape: f32[1,32], index: 4, kind: input, shape index: {}]   ;;  %s456_s5 = inlined_call_operand.vmem [shape: f32[1,32], index: 5, kind: input, shape index: {}]   ;;  %s457_s6 = inlined_call_operand.vmem [shape: f32[1,32], index: 6, kind: input, shape index: {}]   ;;  %s458_s7 = inlined_call_operand.vmem [shape: f32[16,32], index: 7, kind: output, shape index: {}]  }
   0x1   :  { %310 = vmatprep.subr.bf16.mxu0 %v351_v0  ;;  %v333_v1 = vld [vmem:[%s451_s1] sm:$0xff]   ;;  %314 = vmatprep.mubr.msk.bf16.mxu0 %vm352_vm0, %v351_v0  ;;  %v334_v2 = vld [vmem:[%s451_s1 + $0x8] sm:$0xff]   ;;  %v337_v8 = vld [vmem:[%s453_s3 + $0x10] sm:$0xff]   ;;  %vm192_vm4 = vcmask 523264  }
   0x2   :  { %318 = vmatprep.subr.bf16.mxu1 %v351_v0  ;;  %326 = vmatprep.mubr.msk.bf16.mxu1 %vm352_vm0, %v351_v0  ;;  %v403_v3 = vld [vmem:[%s452_s0] sm:$0xff]  ;;  %v408_v4 = vld [vmem:[%s452_s0 + $0x8] sm:$0xff]  ;;  %v338_v9 = vld [vmem:[%s453_s3 + $0x18] sm:$0xff]  }
   0x3   :  { %311 = vmatpush3.bf16.msra.mxu0 %v333_v1  ;;  %v29_v5 = vpack.c.bf16 %v408_v4, %v403_v3  ;;  %v335_v6 = vld [vmem:[%s453_s3] sm:$0xff]   ;;  %v336_v7 = vld [vmem:[%s453_s3 + $0x8] sm:$0xff]  }
   0x4   :  { %312 = vmatprep.subr.bf16.mxu0 %v351_v0  ;;  %319 = vmatpush3.bf16.msra.mxu1 %v335_v6  ;;  %v290_v10 = vld [vmem:[%s454_s2] ss:$0 sm:$0xff] }
   0x5   :  { %320 = vmatprep.subr.bf16.mxu1 %v351_v0 }
   0x7   :  { %313 = vmatpush3.bf16.msra.mxu0 %v334_v2 }
   0x8   :  { %321 = vmatpush3.bf16.msra.mxu1 %v336_v7  ;;  %v294_v7 = vld [vmem:[%s455_s4] ss:$0 sm:$0xff] }
   0x9   :  { %322 = vmatprep.subr.bf16.mxu1 %v351_v0 }
   0xa   :  { %315 = vmatmul.mubr.msk.bf16.vlgmr.msra.gmra.mrb[0].mxu0 %vm53_vm1, %v29_v5 }
   0xc   :  { %323 = vmatpush3.bf16.msra.mxu1 %v337_v8 }
   0xd   :  { %324 = vmatprep.subr.bf16.mxu1 %v351_v0 }
  0x10   :  { %325 = vmatpush3.bf16.msra.mxu1 %v338_v9 }
  0xdd   :  { %v91_v11 = vpop.f32.mrb[0].mxu0 }
  0xde   :  { %v92_v12 = vadd.f32 %v290_v10, %v91_v11  ;;  %v316_v13 = vpop.f32.mrb[1].mxu0 }
  0xdf   :  { %v94_v14 = vpop.f32.mrb[2].mxu0 }
  0xe0   :  { %v100_v15 = vmul.f32 0.70710677, %v92_v12  ;;  %v95_v16 = vadd.f32 %v290_v10, %v94_v14  ;;  %v317_v17 = vpop.f32.mrb[3].mxu0  ;;  %v98_v63 = vmul.f32 0.5, %v92_v12 }
  0xe2   :  { %v106_v18 = vand.u32 2147483647, %v100_v15  ;;  %v101_v19 = vmul.f32 0.70710677, %v95_v16  ;;  %vm102_vm2 = vcmp.ge.f32.partialorder %v100_v15, 0.0  ;;  %v99_v0 = vmul.f32 0.5, %v95_v16 }
  0xe3   :  { %v104_v56 = vsel %vm102_vm2, 1.0, %v353_v55 }
  0xe4   :  { %v108_v20 = vmul.f32 0.3275911, %v106_v18  ;;  %v107_v21 = vand.u32 2147483647, %v101_v19  ;;  %v134_v25 = vsub.f32 0.0, %v106_v18  ;;  %vm103_vm3 = vcmp.ge.f32.partialorder %v101_v19, 0.0 }
  0xe5   :  { %v105_v60 = vsel %vm103_vm3, 1.0, %v353_v55 }
  0xe6   :  { %v110_v22 = vadd.f32 1.0, %v108_v20  ;;  %v109_v23 = vmul.f32 0.3275911, %v107_v21  ;;  %v135_v26 = vsub.f32 0.0, %v107_v21  ;;  %v136_v28 = vmul.f32 %v134_v25, %v106_v18 }
  0xe8   :  { %339 = vrcp.f32 %v110_v22  ;;  %v111_v24 = vadd.f32 1.0, %v109_v23  ;;  %v137_v32 = vmul.f32 %v135_v26, %v107_v21  ;;  %v138_v33 = vmul.f32 1.442695, %v136_v28 }
  0xea   :  { %341 = vrcp.f32 %v111_v24  ;;  %v140_v38 = vmul.f32 1.442695, %v137_v32 }
  0xeb   :  { %343 = vpow2.f32 %v138_v33  ;;  %v300_v33 = vld [vmem:[%s456_s5] ss:$0 sm:$0xff] }
  0xec   :  { %345 = vpow2.f32 %v140_v38 }
  0xf2   :  { %v340_v27 = vpop.eup %339 }
  0xf3   :  { %v116_v29 = vmul.f32 1.0614054, %v340_v27 }
  0xf4   :  { %v342_v30 = vpop.eup %341 }
  0xf5   :  { %v118_v31 = vadd.f32 -1.4531521, %v116_v29  ;;  %v117_v34 = vmul.f32 1.0614054, %v342_v30  ;;  %v344_v49 = vpop.eup %343 }
  0xf6   :  { %v346_v53 = vpop.eup %345 }
  0xf7   :  { %v120_v35 = vmul.f32 %v340_v27, %v118_v31  ;;  %v119_v36 = vadd.f32 -1.4531521, %v117_v34 }
  0xf9   :  { %v122_v37 = vadd.f32 1.4214138, %v120_v35  ;;  %v121_v39 = vmul.f32 %v342_v30, %v119_v36  ;;  %v301_v35 = vld [vmem:[%s457_s6] ss:$0 sm:$0xff] }
  0xfb   :  { %v124_v40 = vmul.f32 %v340_v27, %v122_v37  ;;  %v123_v41 = vadd.f32 1.4214138, %v121_v39 }
  0xfd   :  { %v126_v42 = vadd.f32 -0.28449672, %v124_v40  ;;  %v125_v43 = vmul.f32 %v342_v30, %v123_v41 }
  0xff   :  { %v128_v44 = vmul.f32 %v340_v27, %v126_v42  ;;  %v127_v45 = vadd.f32 -0.28449672, %v125_v43 }
 0x101   :  { %v130_v46 = vadd.f32 0.2548296, %v128_v44  ;;  %v129_v47 = vmul.f32 %v342_v30, %v127_v45 }
 0x103   :  { %v132_v48 = vmul.f32 %v340_v27, %v130_v46  ;;  %v131_v50 = vadd.f32 0.2548296, %v129_v47 }
 0x105   :  { %v142_v51 = vmul.f32 %v344_v49, %v132_v48  ;;  %v133_v52 = vmul.f32 %v342_v30, %v131_v50 }
 0x107   :  { %v144_v54 = vsub.f32 1.0, %v142_v51  ;;  %v143_v57 = vmul.f32 %v346_v53, %v133_v52 }
 0x109   :  { %v146_v58 = vmul.f32 %v144_v54, %v104_v56  ;;  %v145_v59 = vsub.f32 1.0, %v143_v57 }
 0x10b   :  { %v148_v61 = vadd.f32 1.0, %v146_v58  ;;  %v147_v62 = vmul.f32 %v145_v59, %v105_v60 }
 0x10d   :  { %v149_v1 = vadd.f32 1.0, %v147_v62  ;;  %v150_v2 = vmul.f32 %v148_v61, %v98_v63 }
 0x10f   :  { %v151_v5 = vmul.f32 %v149_v1, %v99_v0 }
 0x111   :  { %v152_v6 = vpack.c.bf16 %v151_v5, %v150_v2 }
 0x113   :  { %327 = vmatmul.mubr.msk.bf16.vlgmr.msra.gmra.mrb[0].mxu1 %vm192_vm4, %v152_v6 }
 0x1e6   :  { %v230_v8 = vpop.f32.mrb[0].mxu1 }
 0x1e7   :  { %v231_v9 = vadd.f32 %v294_v7, %v230_v8  ;;  %v328_v10 = vpop.f32.mrb[1].mxu1 }
 0x1e8   :  { %v233_v11 = vpop.f32.mrb[2].mxu1 }
 0x1e9   :  { %v234_v13 = vadd.f32 %v294_v7, %v233_v11  ;;  %v329_v14 = vpop.f32.mrb[3].mxu1  ;;  %v237_v15 = vadd.f32 %v231_v9, %v403_v3 }
 0x1eb   :  { %v241_v12 = vsel %vm53_vm1, %v237_v15, 0.0  ;;  %v238_v16 = vadd.f32 %v234_v13, %v408_v4 }
 0x1ec   :  { %242 = vadd.xlane.f32.xlu0 %v241_v12 }
 0x1ed   :  { %v244_v17 = vsel %vm53_vm1, %v238_v16, 0.0 }
 0x1f0   :  { %245 = vadd.xlane.f32.xlu0 %v244_v17 }
 0x279   :  { %v243_v18 = vpop.xlane.xlu0 %242 }
 0x27a   :  { %v248_v19 = vmul.f32 0.03125, %v243_v18 }
 0x27c   :  { %v250_v20 = vsub.f32 %v237_v15, %v248_v19 }
 0x27d   :  { %v246_v21 = vpop.xlane.xlu0 %245 }
 0x27e   :  { %v249_v22 = vmul.f32 0.03125, %v246_v21  ;;  %v252_v23 = vmul.f32 %v250_v20, %v250_v20 }
 0x280   :  { %v251_v24 = vsub.f32 %v238_v16, %v249_v22  ;;  %v254_v25 = vsel %vm53_vm1, %v252_v23, 0.0 }
 0x281   :  { %255 = vadd.xlane.f32.xlu1 %v254_v25 }
 0x282   :  { %v253_v26 = vmul.f32 %v251_v24, %v251_v24 }
 0x284   :  { %v257_v3 = vsel %vm53_vm1, %v253_v26, 0.0 }
 0x285   :  { %258 = vadd.xlane.f32.xlu1 %v257_v3 }
 0x30e   :  { %v256_v27 = vpop.xlane.xlu1 %255 }
 0x30f   :  { %v260_v4 = vmul.f32 0.03125, %v256_v27 }
 0x311   :  { %v262_v28 = vadd.f32 1e-12, %v260_v4 }
 0x312   :  { %v259_v29 = vpop.xlane.xlu1 %258 }
 0x313   :  { %347 = vrsqrt.f32 %v262_v28  ;;  %v261_v30 = vmul.f32 0.03125, %v259_v29 }
 0x315   :  { %v263_v31 = vadd.f32 1e-12, %v261_v30 }
 0x317   :  { %349 = vrsqrt.f32 %v263_v31 }
 0x31d   :  { %v348_v32 = vpop.eup %347 }
 0x31e   :  { %v266_v34 = vmul.f32 %v348_v32, %v250_v20 }
 0x320   :  { %v274_v36 = vmul.f32 %v300_v33, %v266_v34 }
 0x321   :  { %v350_v37 = vpop.eup %349 }
 0x322   :  { %v282_v38 = vadd.f32 %v301_v35, %v274_v36  ;;  %v267_v39 = vmul.f32 %v350_v37, %v251_v24 }
 0x324   :  { %284 = vst.msk [vmem:[%s458_s7] sm:$0xff] %vm53_vm1, %v282_v38  ;;  %v275_v40 = vmul.f32 %v300_v33, %v267_v39 }
 0x326   :  { %v283_v41 = vadd.f32 %v301_v35, %v275_v40 }
 0x328   :  { %285 = vst.msk [vmem:[%s458_s7 + $0x8] sm:$0xff] %vm53_vm1, %v283_v41 }

// kernel: transformer_layer_forward.13
= control target key start
LH: loop header
LB: loop body
LE: loop exit
PB: predicated region body
PF: predicated region fallthrough
CT: control target
= control target key end

     0   :  { %11 = vsyncpa [#allocation4], 0  ;;  %s1481_s0 = inlined_call_operand.vmem [shape: bf16[2,8,32], index: 0, kind: input, shape index: {}]   ;;  %s1482_s1 = inlined_call_operand.vmem [shape: bf16[2,8,32], index: 1, kind: input, shape index: {}]   ;;  %s1483_s2 = inlined_call_operand.vmem [shape: bf16[2,8,32], index: 2, kind: input, shape index: {}]   ;;  %s1484_s3 = inlined_call_operand.vmem [shape: f32[2,1,8], index: 3, kind: input, shape index: {}]   ;;  %s1485_s4 = inlined_call_operand.vmem [shape: bf16[2,8,32], index: 4, kind: output, shape index: {0}]   ;;  %s1486_s5 = inlined_call_operand.hbm [shape: f32[2,4,8,8], index: 5, kind: output, shape index: {1}]  }
   0x1   :  { %13 = vsyncpa [#allocation4 + $0x1], 0  ;;  %s1261_s18 = smov 0   ;;  %s1263_s19 = smov 0  }
   0x2   :  { %s1265_s20 = smov 0   ;;  %s1267_s21 = smov 0  }
   0x3   :  { %s1269_s22 = smov 0   ;;  %s1271_s23 = smov 0  }
   0x4 LB: > { %s964_s24 = sadd.s32 4294967295, %s1219_s23   ;;  %s965_s25 = sadd.s32 4294967294, %s1219_s23   ;;  %s1219_s23 = sphi %s1271_s23, %s19_s23   ;;  %s1215_s22 = sphi %s1269_s22, %s1493_s22   ;;  %s1211_s21 = sphi %s1267_s21, %s1492_s21   ;;  %s1207_s20 = sphi %s1265_s20, %s1491_s20   ;;  %s1203_s19 = sphi %s1263_s19, %s1490_s19   ;;  %s1199_s18 = sphi %s1261_s18, %s1489_s18  }
   0x5   : > { %s31_s26 = sadd.s32 1, %s1215_s22  ;;  %s174_s27 = sadd.s32 1, %s1207_s20 }
   0x6   : > { %p33_p0 = scmp.ge.s32.totalorder %s31_s26, 2  ;;  %p184_p1 = scmp.ne.s32.totalorder %s1207_s20, %s1203_s19 }
   0x7   : > { %p185_p2 = scmp.eq.s32.totalorder %s964_s24, 1  ;;  %p190_p3 = scmp.ne.s32.totalorder %s1203_s19, %s1199_s18 }
   0x8   : > { %s1495_s26 = smov (%p33_p0, %s31_s26), 0  ;;  %p191_p5 = scmp.eq.s32.totalorder %s965_s25, 1 }
   0x9   : > { %p1301_p4 = por %p185_p2, %p184_p1  ;;  %s169_s29 = ssub.s32 %s1215_s22, %s1495_s26 }
   0xa   : > { %p968_p6 = scmp.ge.s32.totalorder %s1219_s23, 1  ;;  %p172_p7 = scmp.eq.s32.totalorder %s169_s29, 0 }
   0xb   : > { %p1308_p8 = por %p191_p5, %p190_p3  ;;  %p239_p9 = scmp.lt.s32.totalorder %s1219_s23, 3 }
   0xc   : > { %s1314_s6 = scalar_select %p172_p7, %s1207_s20, %s174_s27  }
   0xd   : > { %p240_p10 = pnand %p968_p6, %p239_p9 }
   0xe   : > { %p287_p11 = scmp.lt.s32.totalorder (!%p240_p10), %s1211_s21, 1  ;;  %v1221_v0 = vmov (!%p240_p10), 0.0   ;;  %vm1222_vm0 = vmmov (!%p240_p10), 0   ;;  %vm325_vm1 = vcmask (!%p240_p10), 64512   ;;  %v320_v4 = vlaneseq (!%p240_p10)  ;;  %s1223_s24 = smov (!%p240_p10), 120  }
   0xf   : > { %243 = sbr.rel (%p240_p10) target bundleno = 1494 (0x5d6), region = 36  ;;  %1010 = vmatprep.subr.bf16.mxu0 (!%p240_p10), %v1221_v0  ;;  %1012 = vmatprep.mubr.msk.bf16.mxu0 (!%p240_p10), %vm1222_vm0, %v1221_v0  ;;  %s1224_s25 = smov (!%p240_p10), 112   ;;  %vm388_vm3 = vcmask (!%p240_p10), 1043456  }
  0x10   : > { %1016 = vmatprep.subr.bf16.mxu1 (!%p240_p10), %v1221_v0  ;;  %1018 = vmatprep.mubr.msk.bf16.mxu1 (!%p240_p10), %vm1222_vm0, %v1221_v0  ;;  %v321_v6 = vshrl.u32 (!%p240_p10), %v320_v4, 7  ;;  %s1225_s27 = smov (!%p240_p10), 104   ;;  %s284_s10 = sand.u32 (!%p240_p10), 1, %s1203_s19  }
  0x11   : > { %s1226_s13 = smov (!%p240_p10), 8   ;;  %s993_s15 = sshll.u32 (!%p240_p10), %s1211_s21, 9 }
  0x12   : > { %v322_v7 = vsub.s32 (!%p240_p10), 0, %v321_v6 }
  0x16   : > { %s288_s7 = scalar_select %p287_p11, %s1211_s21, 1 }
  0x17   : > { %s1228_s21 = smov [#allocation3]  }
  0x18   : > { %s1324_s8 = sshll.u32 %s288_s7, 2  ;;  %s304_s17 = scalar_lea.vmem %s1484_s3, %s288_s7 }
  0x19   : > { %s297_s11 = scalar_lea.vmem %s1482_s1, %s1324_s8  ;;  %s293_s14 = scalar_lea.vmem %s1481_s0, %s1324_s8  ;;  %v316_v5 = vld [vmem:[%s304_s17] sm:$0x1] }
  0x1a   : > { %v314_v1 = vld [vmem:[%s297_s11] sm:$0xf]  ;;  %vm317_vm2 = vcmp.gt.f32.partialorder %v316_v5, 0.5  ;;  %s301_s9 = scalar_lea.vmem %s1483_s2, %s1324_s8  ;;  %s969_s11 = sshll.u32 %s284_s10, 5 }
  0x1b   : > { %v330_v2 = vsel %vm325_vm1, %v314_v1, 0  ;;  %v313_v3 = vld [vmem:[%s293_s14] sm:$0xf]  ;;  %v318_v8 = vsel %vm317_vm2, -8.999999e+09, %v1221_v0  ;;  %v977_v16 = vcombine.low %v314_v1, %v314_v1  ;;  %s1367_s12 = scalar_lea.vmem [#allocation3], %s969_s11 }
  0x1c   : > { %1011 = vmatpush3.bf16.xpose.msra.mxu0 %v330_v2  ;;  %v1343_v9 = vrot.slane %v318_v8, %v322_v7  ;;  %v976_v17 = vcombine.low %v313_v3, %v313_v3  ;;  %v1357_v23 = vld [vmem:[%s301_s9] sm:$0xf]  ;;  %s1227_s14 = smov 16   ;;  %s825_s16 = sshll.u32 %s1367_s12, 4  ;;  %s1426_s16 = int_to_ptr.vmem [resolvable:$true] %s825_s16 }
  0x1d   : > { %1028 = vmatprep.subr.bf16.mxu0 %v1221_v0  ;;  %441 = vrot.lane.b32.xlu1 %v977_v16, %s1223_s24  ;;  %v390_v24 = vsel %vm388_vm3, %v1357_v23, 0  ;;  %v980_v7 = vcombine.low %v1357_v23, %v1357_v23  ;;  %s1141_s29 = scalar_lea.vmem %s1426_s16, 512  ;;  %s1145_s7 = sshll.u32 %s1228_s21, 4  ;;  %s1146_s7 = int_to_ptr.vmem [resolvable:$false] %s1145_s7 }
  0x1e   : > { %1017 = vmatpush3.bf16.msra.mxu1 %v390_v24  ;;  %p1142_p12 = scmp.ne.s32.totalorder %s1426_s16, %s1141_s29  ;;  %s1147_s9 = scalar_lea.vmem %s1146_s7, 1024 }
  0x1f   : > { %1022 = vmatprep.subr.bf16.mxu1 %v1221_v0  ;;  %p1148_p1 = scmp.lt.s32.totalorder %s1426_s16, %s1146_s7  ;;  %p1149_p2 = scmp.lt.s32.totalorder %s1147_s9, %s1141_s29 }
  0x20   : > { %p1143_p13 = pnand %p1142_p12, %p1301_p4 }
  0x21   : > { %436 = vrot.lane.b32.xlu1 %v976_v17, %s1223_s24  ;;  %p1150_p3 = por %p1149_p2, %p1148_p1 }
  0x22   : > { %p1144_p0 = pneg %p1143_p13 }
  0x23   : > { %1013 = vmatmul.mubr.msk.bf16.vlgmr.msra.gmra.mrb[0].mxu0 %vm325_vm1, %v313_v3 }
  0x24   : > { %1030 = vmatprep.mubr.msk.bf16.mxu0 %vm1222_vm0, %v1221_v0  ;;  %p1151_p5 = pnand %p1150_p3, %p1144_p0 }
  0x25   : > { %560 = vrot.lane.b32.xlu1 %v976_v17, %s1224_s25 }
  0x29   : > { %680 = vrot.lane.b32.xlu1 %v977_v16, %s1225_s27 }
  0x2d   : > { %678 = vrot.lane.b32.xlu1 %v976_v17, %s1225_s27 }
  0x8f   : > { %v442_v27 = vpop.permute.xlu1 %441 }
  0x90   : > { %v447_v29 = vsel %vm325_vm1, %v442_v27, 0 }
  0x93   : > { %v437_v31 = vpop.permute.xlu1 %436 }
  0x97   : > { %v561_v33 = vpop.permute.xlu1 %560 }
  0x9b   : > { %v681_v35 = vpop.permute.xlu1 %680 }
  0x9c   : > { %v686_v36 = vsel %vm325_vm1, %v681_v35, 0 }
  0x9f   : > { %v679_v37 = vpop.permute.xlu1 %678 }
  0xf6   : > { %v366_v10 = vpop.f32.mrb[0].mxu0 }
  0xf7   : > { %v367_v11 = vadd.f32 %v366_v10, %v1343_v9  ;;  %v1014_v12 = vpop.f32.mrb[1].mxu0 }
  0xf8   : > { %v369_v13 = vpop.f32.mrb[2].mxu0 }
  0xf9   : > { %v1015_v14 = vpop.f32.mrb[3].mxu0  ;;  %v372_v15 = vsel %vm325_vm1, %v367_v11, -inf }
  0xfa   : > { %373 = vmax.xlane.f32.xlu0 %v372_v15 }
 0x187   : > { %v374_v18 = vpop.xlane.xlu0 %373 }
 0x188   : > { %v375_v19 = vsub.f32 %v367_v11, %v374_v18 }
 0x18a   : > { %v376_v20 = vmul.f32 1.442695, %v375_v19 }
 0x18c   : > { %1125 = vpow2.f32 %v376_v20 }
 0x196   : > { %v1126_v21 = vpop.eup %1125 }
 0x197   : > { %v378_v22 = vsel %vm325_vm1, %v1126_v21, 0.0 }
 0x198   : > { %379 = vadd.xlane.f32.xlu0 %v378_v22 }
 0x1ae   : > { %562 = vrot.lane.b32.xlu0 %v977_v16, %s1224_s25 }
 0x225   : > { %v380_v25 = vpop.xlane.xlu0 %379 }
 0x226   : > { %1127 = vrcp.f32 %v380_v25 }
 0x229   : > { %v563_v32 = vpop.permute.xlu0 %562 }
 0x22a   : > { %v568_v34 = vsel %vm325_vm1, %v563_v32, 0 }
 0x230   : > { %v1128_v26 = vpop.eup %1127 }
 0x231   : > { %v382_v28 = vmul.f32 %v1128_v26, %v1126_v21 }
 0x233   : > { %383 = vst.msk [vmem:[%s1367_s12] sm:$0xff] %vm325_vm1, %v382_v28  ;;  %v384_v30 = vpack.c.bf16 %v382_v28, %v382_v28 }
 0x235   : > { %1019 = vmatmul.mubr.msk.bf16.vlgmr.msra.gmra.mrb[0].mxu1 %vm325_vm1, %v384_v30 }
 0x236   : > { %1023 = vmatpush3.bf16.xpose.msra.mxu1 %v447_v29  ;;  %1024 = vmatprep.mubr.msk.bf16.mxu1 %vm1222_vm0, %v1221_v0 }
 0x237   : > { %1034 = vmatprep.subr.bf16.mxu1 %v1221_v0 }
 0x23d   : > { %1025 = vmatmul.mubr.msk.bf16.vlgmr.msra.gmra.mrb[4].mxu1 %vm325_vm1, %v437_v31 }
 0x23e   : > { %1035 = vmatpush3.bf16.xpose.msra.mxu1 %v568_v34  ;;  %1036 = vmatprep.mubr.msk.bf16.mxu1 %vm1222_vm0, %v1221_v0 }
 0x23f   : > { %1046 = vmatprep.subr.bf16.mxu1 %v1221_v0 }
 0x245   : > { %1037 = vmatmul.mubr.msk.bf16.vlgmr.msra.gmra.mrb[8].mxu1 %vm325_vm1, %v561_v33 }
 0x246   : > { %1047 = vmatpush3.bf16.xpose.msra.mxu1 %v686_v36  ;;  %1048 = vmatprep.mubr.msk.bf16.mxu1 %vm1222_vm0, %v1221_v0 }
 0x24d   : > { %1049 = vmatmul.mubr.msk.bf16.vlgmr.msra.gmra.mrb[12].mxu1 %vm325_vm1, %v679_v37 }
 0x308   : > { %v426_v38 = vpop.f32.mrb[0].mxu1 }
 0x309   : > { %432 = vst.msk [vmem:[#allocation2] sm:$0xff] %vm325_vm1, %v426_v38  ;;  %v1020_v39 = vpop.f32.mrb[1].mxu1 }
 0x30a   : > { %v429_v40 = vpop.f32.mrb[2].mxu1 }
 0x30b   : > { %v1021_v41 = vpop.f32.mrb[3].mxu1 }
 0x310   : > { %v483_v42 = vpop.f32.mrb[4].mxu1 }
 0x311   : > { %v484_v43 = vadd.f32 %v483_v42, %v1343_v9  ;;  %v1026_v44 = vpop.f32.mrb[5].mxu1 }
 0x312   : > { %v486_v45 = vpop.f32.mrb[6].mxu1 }
 0x313   : > { %v1027_v46 = vpop.f32.mrb[7].mxu1  ;;  %v489_v47 = vsel %vm325_vm1, %v484_v43, -inf }
 0x314   : > { %490 = vmax.xlane.f32.xlu1 %v489_v47 }
 0x318   : > { %v604_v48 = vpop.f32.mrb[8].mxu1 }
 0x319   : > { %v605_v49 = vadd.f32 %v604_v48, %v1343_v9  ;;  %v1038_v50 = vpop.f32.mrb[9].mxu1 }
 0x31a   : > { %v607_v51 = vpop.f32.mrb[10].mxu1 }
 0x31b   : > { %v610_v52 = vsel %vm325_vm1, %v605_v49, -inf  ;;  %v1039_v53 = vpop.f32.mrb[11].mxu1 }
 0x31c   : > { %611 = vmax.xlane.f32.xlu0 %v610_v52 }
 0x320   : > { %v722_v54 = vpop.f32.mrb[12].mxu1 }
 0x321   : > { %v723_v55 = vadd.f32 %v722_v54, %v1343_v9  ;;  %v1050_v56 = vpop.f32.mrb[13].mxu1 }
 0x322   : > { %v725_v57 = vpop.f32.mrb[14].mxu1 }
 0x323   : > { %v728_v58 = vsel %vm325_vm1, %v723_v55, -inf  ;;  %v1051_v59 = vpop.f32.mrb[15].mxu1 }
 0x324   : > { %729 = vmax.xlane.f32.xlu1 %v728_v58 }
 0x3a1   : > { %v491_v60 = vpop.xlane.xlu1 %490 }
 0x3a2   : > { %v492_v61 = vsub.f32 %v484_v43, %v491_v60 }
 0x3a4   : > { %v493_v62 = vmul.f32 1.442695, %v492_v61 }
 0x3a6   : > { %1129 = vpow2.f32 %v493_v62 }
 0x3a9   : > { %v612_v63 = vpop.xlane.xlu0 %611 }
 0x3aa   : > { %v613_v1 = vsub.f32 %v605_v49, %v612_v63 }
 0x3ac   : > { %v614_v2 = vmul.f32 1.442695, %v613_v1 }
 0x3ae   : > { %1131 = vpow2.f32 %v614_v2 }
 0x3b0   : > { %v1130_v3 = vpop.eup %1129 }
 0x3b1   : > { %v495_v4 = vsel %vm325_vm1, %v1130_v3, 0.0  ;;  %v730_v8 = vpop.xlane.xlu1 %729 }
 0x3b2   : > { %496 = vadd.xlane.f32.xlu1 %v495_v4  ;;  %v731_v9 = vsub.f32 %v723_v55, %v730_v8 }
 0x3b4   : > { %v732_v10 = vmul.f32 1.442695, %v731_v9 }
 0x3b6   : > { %1133 = vpow2.f32 %v732_v10 }
 0x3b8   : > { %v1132_v5 = vpop.eup %1131 }
 0x3b9   : > { %v616_v6 = vsel %vm325_vm1, %v1132_v5, 0.0 }
 0x3ba   : > { %617 = vadd.xlane.f32.xlu0 %v616_v6 }
 0x3c0   : > { %v1134_v11 = vpop.eup %1133 }
 0x3c1   : > { %v734_v12 = vsel %vm325_vm1, %v1134_v11, 0.0 }
 0x3c3   : > { %624 = vrot.lane.b32.xlu1 %v980_v7, %s1224_s25  ;;  %s1424_s25 = scalar_lea.hbm %s1486_s5, %s993_s15 }
 0x3d0   : > { %506 = vrot.lane.b32.xlu0 %v980_v7, %s1223_s24 }
 0x3e7   : > { %735 = vadd.xlane.f32.xlu1 %v734_v12 }
 0x3f8   : > { %742 = vrot.lane.b32.xlu1 %v980_v7, %s1225_s27  ;;  %s1430_s27 = scalar_lea.sflag [#allocation4], %s284_s10 }
 0x43f   : > { %v497_v13 = vpop.xlane.xlu1 %496 }
 0x440   : > { %1135 = vrcp.f32 %v497_v13 }
 0x443   : > { %v625_v19 = vpop.permute.xlu1 %624 }
 0x444   : > { %v630_v21 = vsel %vm388_vm3, %v625_v19, 0 }
 0x447   : > { %v618_v14 = vpop.xlane.xlu0 %617 }
 0x448   : > { %1137 = vrcp.f32 %v618_v14 }
 0x44a   : > { %v1136_v15 = vpop.eup %1135 }
 0x44b   : > { %v499_v16 = vmul.f32 %v1136_v15, %v1130_v3  ;;  %v507_v17 = vpop.permute.xlu0 %506 }
 0x44c   : > { %v512_v18 = vsel %vm388_vm3, %v507_v17, 0 }
 0x44d   : > { %979 = vst.msk [vmem:[%s1367_s12 + $0x8] sm:$0xff] %vm325_vm1, %v499_v16  ;;  %1029 = vmatpush3.bf16.msra.mxu0 %v512_v18  ;;  %v502_v20 = vpack.c.bf16 %v499_v16, %v499_v16 }
 0x44e   : > { %1040 = vmatprep.subr.bf16.mxu0 %v1221_v0 }
 0x450   : > { %1031 = vmatmul.mubr.msk.bf16.vlgmr.msra.gmra.mrb[4].mxu0 %vm325_vm1, %v502_v20 }
 0x451   : > { %1041 = vmatpush3.bf16.msra.mxu0 %v630_v21  ;;  %1042 = vmatprep.mubr.msk.bf16.mxu0 %vm1222_vm0, %v1221_v0 }
 0x452   : > { %v1138_v22 = vpop.eup %1137  ;;  %1052 = vmatprep.subr.bf16.mxu0 %v1221_v0 }
 0x453   : > { %v620_v23 = vmul.f32 %v1138_v22, %v1132_v5 }
 0x455   : > { %983 = vst.msk [vmem:[%s1367_s12 + $0x10] sm:$0xff] %vm325_vm1, %v620_v23  ;;  %v623_v24 = vpack.c.bf16 %v620_v23, %v620_v23 }
 0x458   : > { %1043 = vmatmul.mubr.msk.bf16.vlgmr.msra.gmra.mrb[8].mxu0 %vm325_vm1, %v623_v24 }
 0x459   : > { %1054 = vmatprep.mubr.msk.bf16.mxu0 %vm1222_vm0, %v1221_v0 }
 0x474   : > { %v736_v25 = vpop.xlane.xlu1 %735 }
 0x475   : > { %1139 = vrcp.f32 %v736_v25 }
 0x478   : > { %v743_v26 = vpop.permute.xlu1 %742 }
 0x479   : > { %v748_v27 = vsel %vm388_vm3, %v743_v26, 0 }
 0x47a   : > { %1053 = vmatpush3.bf16.msra.mxu0 %v748_v27 }
 0x47f   : > { %v1140_v28 = vpop.eup %1139 }
 0x480   : > { %v738_v29 = vmul.f32 %v1140_v28, %v1134_v11 }
 0x482   : > { %986 = vst.msk [vmem:[%s1367_s12 + $0x18] sm:$0xff] %vm325_vm1, %v738_v29  ;;  %v741_v30 = vpack.c.bf16 %v738_v29, %v738_v29 }
 0x484   : > { %1055 = vmatmul.mubr.msk.bf16.vlgmr.msra.gmra.mrb[12].mxu0 %vm325_vm1, %v741_v30 }
 0x523   : > { %v548_v31 = vpop.f32.mrb[4].mxu0 }
 0x524   : > { %555 = vrot.lane.b32.xlu0 %v548_v31, %s1226_s13  ;;  %v1032_v0 = vpop.f32.mrb[5].mxu0 }
 0x525   : > { %v551_v32 = vpop.f32.mrb[6].mxu0 }
 0x526   : > { %v1033_v33 = vpop.f32.mrb[7].mxu0 }
 0x52b   : > { %v666_v34 = vpop.f32.mrb[8].mxu0 }
 0x52c   : > { %673 = vrot.lane.b32.xlu1 %v666_v34, %s1227_s14  ;;  %v1044_v35 = vpop.f32.mrb[9].mxu0 }
 0x52d   : > { %v669_v36 = vpop.f32.mrb[10].mxu0 }
 0x52e   : > { %v1045_v37 = vpop.f32.mrb[11].mxu0 }
 0x52f   : > { %1154 = shalt.err (!%p1151_p5)
}
 0x530   : > { %s1155_s10 = scalar_lea.hbm %s1424_s25, 512  ;;  %s1159_s14 = scalar_lea.hbm %s1486_s5, 1024 }
 0x531   : > { %p1156_p6 = scmp.ne.s32.totalorder %s1424_s25, %s1155_s10  ;;  %p1160_p10 = scmp.lt.u32.totalorder %s1424_s25, %s1486_s5 }
 0x532   : > { %p1161_p11 = scmp.lt.u32.totalorder %s1159_s14, %s1155_s10  ;;  %p1163_p13 = scmp.lt.u32.totalorder %s1155_s10, %s1424_s25 }
 0x533   : > { %p1157_p7 = pnand %p1156_p6, %p1301_p4 }
 0x534   : > { %p1162_p12 = por %p1161_p11, %p1160_p10 }
 0x535   : > { %p1158_p9 = pneg %p1157_p7 }
 0x536   : > { %p1164_p0 = por %p1163_p13, %p1162_p12 }
 0x538   : > { %p1165_p1 = pnand %p1164_p0, %p1158_p9 }
 0x53a   : > { %1168 = shalt.err (!%p1165_p1)
}
 0x53b   : > { %s1229_s24 = smov 128   ;;  %s1230_s29 = smov 24   ;;  %vm558_vm4 = vcmask 130112   ;;  %vm676_vm5 = vcmask 195712   ;;  %vm794_vm6 = vcmask 261312   ;;  %vm798_vm7 = vcmask 257024  }
 0x53c   : > { %1058 = dma.vmem_to_hbm [thread:$0]  (%p1301_p4), %s1426_s16, 512, %s1424_s25, %s1430_s27, %s1229_s24, %s1229_s24, %s1226_s13  }
 0x53d   : > { %s311_s13 = scalar_lea.vmem %s1485_s4, %s1324_s8 }
 0x557   : > { %v784_v38 = vpop.f32.mrb[12].mxu0 }
 0x558   : > { %791 = vrot.lane.b32.xlu0 %v784_v38, %s1230_s29  ;;  %v1056_v39 = vpop.f32.mrb[13].mxu0 }
 0x559   : > { %v787_v40 = vpop.f32.mrb[14].mxu0 }
 0x55a   : > { %v1057_v41 = vpop.f32.mrb[15].mxu0 }
 0x596   : > { %v556_v42 = vpop.permute.xlu0 %555 }
 0x597   : > { %559 = vst.msk [vmem:[#allocation2] sm:$0xff] %vm558_vm4, %v556_v42 }
 0x59e   : > { %v674_v43 = vpop.permute.xlu1 %673 }
 0x59f   : > { %677 = vst.msk [vmem:[#allocation2] sm:$0xff] %vm676_vm5, %v674_v43 }
 0x5ca   : > { %v792_v44 = vpop.permute.xlu0 %791 }
 0x5cb   : > { %795 = vst.msk [vmem:[#allocation2] sm:$0xff] %vm794_vm6, %v792_v44 }
 0x5d2   : > { %v796_v45 = vld [vmem:[#allocation2] sm:$0xff] }
 0x5d3   : > { %v797_v46 = vpack.c.bf16 %v796_v45, %v796_v45 }
 0x5d5   : > { %799 = vst.msk [vmem:[%s311_s13] sm:$0xf] %vm798_vm7, %v797_v46 }
 0x5d6 PF: > { %p1064_p4 = scmp.ge.s32.totalorder %s1219_s23, 2  ;;  %s850_s16 = sand.u32 1, %s1199_s18  }
 0x5d7   : > { %s851_s25 = scalar_lea.sflag [#allocation4], %s850_s16 }
 0x5d8   : > { %p1061_p2 = pnand %p1064_p4, %p1308_p8 }
 0x5da   : > { %1194 = dma.done.wait (!%p1061_p2), %s851_s25, 512  }
 0x5db   : > { %1196 = vsyncadd (!%p1061_p2), %s851_s25, 4294966784  ;;  %s19_s23 = sadd.s32 1, %s1219_s23   ;;  %s1489_s18 = smov %s1203_s19 }
 0x5dc   : > { %p16_p3 = scmp.ge.s32.totalorder %s19_s23, 4   ;;  %s1490_s19 = smov %s1207_s20 }
 0x5dd   : > { %s1491_s20 = smov %s1314_s6  ;;  %s1492_s21 = smov %s1215_s22 }
 0x5de   : > { %s1493_s22 = smov %s1495_s26  ;;  %18 = sbr.rel (!%p16_p3) target bundleno = 4 (0x4), region = 95 }
 0x5e5   :  { %856 = vsyncpa [#allocation4], 1 }
 0x5e6   :  { %858 = vsyncpa [#allocation4 + $0x1], 1 }

// kernel: transformer_layer_forward.20
= control target key start
LH: loop header
LB: loop body
LE: loop exit
PB: predicated region body
PF: predicated region fallthrough
CT: control target
= control target key end

     0   :  { %v139_v0 = vmov 0.0   ;;  %vm140_vm0 = vmmov 0   ;;  %vm43_vm1 = vcmask 261120   ;;  %vm96_vm2 = vcmask 257024   ;;  %s194_s1 = inlined_call_operand.vmem [shape: bf16[32,64], index: 1, kind: input, shape index: {}]   ;;  %s195_s0 = inlined_call_operand.vmem [shape: f32[16,32], index: 0, kind: input, shape index: {}]   ;;  %s196_s2 = inlined_call_operand.vmem [shape: f32[1,64], index: 2, kind: input, shape index: {}]   ;;  %s197_s3 = inlined_call_operand.vmem [shape: bf16[16,32], index: 3, kind: output, shape index: {0}]   ;;  %s198_s4 = inlined_call_operand.vmem [shape: bf16[16,32], index: 4, kind: output, shape index: {1}]  }
   0x1   :  { %126 = vmatprep.subr.bf16.mxu0 %v139_v0  ;;  %v137_v1 = vld [vmem:[%s194_s1] sm:$0xff]   ;;  %130 = vmatprep.mubr.msk.bf16.mxu0 %vm140_vm0, %v139_v0  ;;  %v138_v2 = vld [vmem:[%s194_s1 + $0x8] sm:$0xff]  }
   0x2   :  { %127 = vmatpush3.bf16.msra.mxu0 %v137_v1  ;;  %v17_v3 = vld [vmem:[%s195_s0] sm:$0xff]  ;;  %v18_v4 = vld [vmem:[%s195_s0 + $0x8] sm:$0xff]  ;;  %s141_s0 = smov 96  }
   0x3   :  { %128 = vmatprep.subr.bf16.mxu0 %v139_v0  ;;  %v19_v5 = vpack.c.bf16 %v18_v4, %v17_v3  ;;  %v115_v6 = vld [vmem:[%s196_s2] ss:$0 sm:$0xff] }
   0x6   :  { %129 = vmatpush3.bf16.msra.mxu0 %v138_v2 }
   0x9   :  { %131 = vmatmul.mubr.msk.bf16.vlgmr.msra.gmra.mrb[0].mxu0 %vm43_vm1, %v19_v5 }
  0xdc   :  { %v81_v7 = vpop.f32.mrb[0].mxu0 }
  0xdd   :  { %v82_v8 = vadd.f32 %v115_v6, %v81_v7  ;;  %v132_v9 = vpop.f32.mrb[1].mxu0 }
  0xde   :  { %v84_v10 = vpop.f32.mrb[2].mxu0 }
  0xdf   :  { %v121_v11 = vpack.c.bf16 %v82_v8, %v82_v8  ;;  %v85_v12 = vadd.f32 %v115_v6, %v84_v10  ;;  %v133_v13 = vpop.f32.mrb[3].mxu0 }
  0xe1   :  { %97 = vst.msk [vmem:[%s197_s3] sm:$0xf] %vm96_vm2, %v121_v11  ;;  %v122_v14 = vpack.c.bf16 %v85_v12, %v85_v12  ;;  %99 = vrot.lane.b32.xlu0 %v121_v11, %s141_s0 }
  0xe3   :  { %98 = vst.msk [vmem:[%s197_s3 + $0x4] sm:$0xf] %vm96_vm2, %v122_v14 }
  0xe5   :  { %101 = vrot.lane.b32.xlu0 %v122_v14, %s141_s0 }
 0x153   :  { %v100_v15 = vpop.permute.xlu0 %99 }
 0x154   :  { %105 = vst.msk [vmem:[%s198_s4] sm:$0xf] %vm96_vm2, %v100_v15 }
 0x157   :  { %v102_v16 = vpop.permute.xlu0 %101 }
 0x158   :  { %106 = vst.msk [vmem:[%s198_s4 + $0x4] sm:$0xf] %vm96_vm2, %v102_v16 }

// kernel: transformer_layer_forward.23
= control target key start
LH: loop header
LB: loop body
LE: loop exit
PB: predicated region body
PF: predicated region fallthrough
CT: control target
= control target key end

     0   :  { %v391_v1 = vmov 0.0   ;;  %vm392_vm0 = vmmov 0   ;;  %s500_s0 = inlined_call_operand.vmem [shape: f32[16,32], index: 0, kind: input, shape index: {}]   ;;  %s501_s1 = inlined_call_operand.vmem [shape: bf16[32,64], index: 1, kind: input, shape index: {}]   ;;  %s502_s2 = inlined_call_operand.vmem [shape: f32[1,64], index: 2, kind: input, shape index: {}]   ;;  %s503_s3 = inlined_call_operand.vmem [shape: bf16[64,32], index: 3, kind: input, shape index: {}]   ;;  %s504_s4 = inlined_call_operand.vmem [shape: f32[1,32], index: 4, kind: input, shape index: {}]   ;;  %s505_s5 = inlined_call_operand.vmem [shape: f32[1,32], index: 5, kind: input, shape index: {}]   ;;  %s506_s6 = inlined_call_operand.vmem [shape: f32[1,32], index: 6, kind: input, shape index: {}]   ;;  %s507_s7 = inlined_call_operand.hbm [shape: f32[16,32], index: 7, kind: output, shape index: {}]  }
   0x1   :  { %v349_v0 = vld [vmem:[%s501_s1] sm:$0xff]   ;;  %323 = vmatprep.subr.bf16.mxu0 %v391_v1  ;;  %331 = vmatprep.subr.bf16.mxu1 %v391_v1  ;;  %v350_v2 = vld [vmem:[%s501_s1 + $0x8] sm:$0xff]  }
   0x2   :  { %324 = vmatpush3.bf16.msra.mxu0 %v349_v0  ;;  %327 = vmatprep.mubr.msk.bf16.mxu0 %vm392_vm0, %v391_v1  ;;  %v446_v3 = vld [vmem:[%s500_s0] sm:$0xff]  ;;  %v451_v4 = vld [vmem:[%s500_s0 + $0x8] sm:$0xff] }
   0x3   :  { %325 = vmatprep.subr.bf16.mxu0 %v391_v1  ;;  %339 = vmatprep.mubr.msk.bf16.mxu1 %vm392_vm0, %v391_v1  ;;  %v30_v5 = vpack.c.bf16 %v451_v4, %v446_v3 }
   0x4   :  { %12 = vsyncpa [#allocation3], 0  ;;  %vm54_vm1 = vcmask 261120   ;;  %v351_v6 = vld [vmem:[%s503_s3] sm:$0xff]   ;;  %v352_v7 = vld [vmem:[%s503_s3 + $0x8] sm:$0xff]   ;;  %v393_v55 = vmov -1.0  }
   0x5   :  { %332 = vmatpush3.bf16.msra.mxu1 %v351_v6  ;;  %v353_v8 = vld [vmem:[%s503_s3 + $0x10] sm:$0xff]   ;;  %v354_v9 = vld [vmem:[%s503_s3 + $0x18] sm:$0xff]   ;;  %v303_v10 = vld [vmem:[%s502_s2] ss:$0 sm:$0xff]  ;;  %vm193_vm4 = vcmask 523264   ;;  %s394_s20 = smov [#allocation2]  }
   0x6   :  { %326 = vmatpush3.bf16.msra.mxu0 %v350_v2  ;;  %333 = vmatprep.subr.bf16.mxu1 %v391_v1  ;;  %s292_s21 = sshll.u32 %s394_s20, 4  ;;  %s293_s21 = int_to_ptr.vmem [resolvable:$true] %s292_s21 }
   0x7   :  { %s367_s22 = scalar_lea.vmem %s293_s21, 256  ;;  %p372_p1 = scmp.lt.s32.totalorder %s293_s21, %s293_s21 }
   0x8   :  { %p368_p0 = scmp.ne.s32.totalorder %s293_s21, %s367_s22  ;;  %p373_p2 = scmp.lt.s32.totalorder %s367_s22, %s367_s22 }
   0x9   :  { %328 = vmatmul.mubr.msk.bf16.vlgmr.msra.gmra.mrb[0].mxu0 %vm54_vm1, %v30_v5  ;;  %334 = vmatpush3.bf16.msra.mxu1 %v352_v7  ;;  %v307_v7 = vld [vmem:[%s504_s4] ss:$0 sm:$0xff] }
   0xa   :  { %335 = vmatprep.subr.bf16.mxu1 %v391_v1  ;;  %p374_p3 = por %p373_p2, %p372_p1 }
   0xc   :  { %p375_p4 = pnand %p374_p3, %p368_p0 }
   0xd   :  { %336 = vmatpush3.bf16.msra.mxu1 %v353_v8 }
   0xe   :  { %337 = vmatprep.subr.bf16.mxu1 %v391_v1 }
  0x11   :  { %338 = vmatpush3.bf16.msra.mxu1 %v354_v9 }
  0xdc   :  { %v92_v11 = vpop.f32.mrb[0].mxu0 }
  0xdd   :  { %v93_v12 = vadd.f32 %v303_v10, %v92_v11  ;;  %v329_v13 = vpop.f32.mrb[1].mxu0 }
  0xde   :  { %v95_v14 = vpop.f32.mrb[2].mxu0 }
  0xdf   :  { %v101_v15 = vmul.f32 0.70710677, %v93_v12  ;;  %v96_v16 = vadd.f32 %v303_v10, %v95_v14  ;;  %v330_v17 = vpop.f32.mrb[3].mxu0  ;;  %v99_v63 = vmul.f32 0.5, %v93_v12 }
  0xe1   :  { %v107_v18 = vand.u32 2147483647, %v101_v15  ;;  %v102_v19 = vmul.f32 0.70710677, %v96_v16  ;;  %vm103_vm2 = vcmp.ge.f32.partialorder %v101_v15, 0.0  ;;  %v100_v0 = vmul.f32 0.5, %v96_v16 }
  0xe2   :  { %v105_v56 = vsel %vm103_vm2, 1.0, %v393_v55 }
  0xe3   :  { %v109_v20 = vmul.f32 0.3275911, %v107_v18  ;;  %v108_v21 = vand.u32 2147483647, %v102_v19  ;;  %v135_v25 = vsub.f32 0.0, %v107_v18  ;;  %vm104_vm3 = vcmp.ge.f32.partialorder %v102_v19, 0.0 }
  0xe4   :  { %v106_v60 = vsel %vm104_vm3, 1.0, %v393_v55 }
  0xe5   :  { %v111_v22 = vadd.f32 1.0, %v109_v20  ;;  %v110_v23 = vmul.f32 0.3275911, %v108_v21  ;;  %v136_v26 = vsub.f32 0.0, %v108_v21  ;;  %v137_v28 = vmul.f32 %v135_v25, %v107_v18 }
  0xe7   :  { %355 = vrcp.f32 %v111_v22  ;;  %v112_v24 = vadd.f32 1.0, %v110_v23  ;;  %v138_v32 = vmul.f32 %v136_v26, %v108_v21  ;;  %v139_v33 = vmul.f32 1.442695, %v137_v28 }
  0xe9   :  { %357 = vrcp.f32 %v112_v24  ;;  %v141_v38 = vmul.f32 1.442695, %v138_v32 }
  0xea   :  { %359 = vpow2.f32 %v139_v33  ;;  %v313_v33 = vld [vmem:[%s505_s5] ss:$0 sm:$0xff] }
  0xeb   :  { %361 = vpow2.f32 %v141_v38 }
  0xf1   :  { %v356_v27 = vpop.eup %355 }
  0xf2   :  { %v117_v29 = vmul.f32 1.0614054, %v356_v27 }
  0xf3   :  { %v358_v30 = vpop.eup %357 }
  0xf4   :  { %v119_v31 = vadd.f32 -1.4531521, %v117_v29  ;;  %v118_v34 = vmul.f32 1.0614054, %v358_v30  ;;  %v360_v49 = vpop.eup %359 }
  0xf5   :  { %v362_v53 = vpop.eup %361 }
  0xf6   :  { %v121_v35 = vmul.f32 %v356_v27, %v119_v31  ;;  %v120_v36 = vadd.f32 -1.4531521, %v118_v34 }
  0xf8   :  { %v123_v37 = vadd.f32 1.4214138, %v121_v35  ;;  %v122_v39 = vmul.f32 %v358_v30, %v120_v36  ;;  %v314_v35 = vld [vmem:[%s506_s6] ss:$0 sm:$0xff] }
  0xfa   :  { %v125_v40 = vmul.f32 %v356_v27, %v123_v37  ;;  %v124_v41 = vadd.f32 1.4214138, %v122_v39 }
  0xfc   :  { %v127_v42 = vadd.f32 -0.28449672, %v125_v40  ;;  %v126_v43 = vmul.f32 %v358_v30, %v124_v41 }
  0xfe   :  { %v129_v44 = vmul.f32 %v356_v27, %v127_v42  ;;  %v128_v45 = vadd.f32 -0.28449672, %v126_v43 }
 0x100   :  { %v131_v46 = vadd.f32 0.2548296, %v129_v44  ;;  %v130_v47 = vmul.f32 %v358_v30, %v128_v45 }
 0x102   :  { %v133_v48 = vmul.f32 %v356_v27, %v131_v46  ;;  %v132_v50 = vadd.f32 0.2548296, %v130_v47 }
 0x104   :  { %v143_v51 = vmul.f32 %v360_v49, %v133_v48  ;;  %v134_v52 = vmul.f32 %v358_v30, %v132_v50 }
 0x106   :  { %v145_v54 = vsub.f32 1.0, %v143_v51  ;;  %v144_v57 = vmul.f32 %v362_v53, %v134_v52 }
 0x108   :  { %v147_v58 = vmul.f32 %v145_v54, %v105_v56  ;;  %v146_v59 = vsub.f32 1.0, %v144_v57 }
 0x10a   :  { %v149_v61 = vadd.f32 1.0, %v147_v58  ;;  %v148_v62 = vmul.f32 %v146_v59, %v106_v60 }
 0x10c   :  { %v150_v1 = vadd.f32 1.0, %v148_v62  ;;  %v151_v2 = vmul.f32 %v149_v61, %v99_v63 }
 0x10e   :  { %v152_v5 = vmul.f32 %v150_v1, %v100_v0 }
 0x110   :  { %v153_v6 = vpack.c.bf16 %v152_v5, %v151_v2 }
 0x112   :  { %340 = vmatmul.mubr.msk.bf16.vlgmr.msra.gmra.mrb[0].mxu1 %vm193_vm4, %v153_v6 }
 0x1e5   :  { %v231_v8 = vpop.f32.mrb[0].mxu1 }
 0x1e6   :  { %v232_v9 = vadd.f32 %v307_v7, %v231_v8  ;;  %v341_v10 = vpop.f32.mrb[1].mxu1 }
 0x1e7   :  { %v234_v11 = vpop.f32.mrb[2].mxu1 }
 0x1e8   :  { %v235_v13 = vadd.f32 %v307_v7, %v234_v11  ;;  %v342_v14 = vpop.f32.mrb[3].mxu1  ;;  %v238_v15 = vadd.f32 %v232_v9, %v446_v3 }
 0x1ea   :  { %v242_v12 = vsel %vm54_vm1, %v238_v15, 0.0  ;;  %v239_v16 = vadd.f32 %v235_v13, %v451_v4 }
 0x1eb   :  { %243 = vadd.xlane.f32.xlu0 %v242_v12 }
 0x1ec   :  { %v245_v17 = vsel %vm54_vm1, %v239_v16, 0.0 }
 0x1ef   :  { %246 = vadd.xlane.f32.xlu0 %v245_v17 }
 0x278   :  { %v244_v18 = vpop.xlane.xlu0 %243 }
 0x279   :  { %v249_v19 = vmul.f32 0.03125, %v244_v18 }
 0x27b   :  { %v251_v20 = vsub.f32 %v238_v15, %v249_v19 }
 0x27c   :  { %v247_v21 = vpop.xlane.xlu0 %246 }
 0x27d   :  { %v250_v22 = vmul.f32 0.03125, %v247_v21  ;;  %v253_v23 = vmul.f32 %v251_v20, %v251_v20 }
 0x27f   :  { %v252_v24 = vsub.f32 %v239_v16, %v250_v22  ;;  %v255_v25 = vsel %vm54_vm1, %v253_v23, 0.0 }
 0x280   :  { %256 = vadd.xlane.f32.xlu1 %v255_v25 }
 0x281   :  { %v254_v26 = vmul.f32 %v252_v24, %v252_v24 }
 0x283   :  { %v258_v3 = vsel %vm54_vm1, %v254_v26, 0.0 }
 0x284   :  { %259 = vadd.xlane.f32.xlu1 %v258_v3 }
 0x30d   :  { %v257_v27 = vpop.xlane.xlu1 %256 }
 0x30e   :  { %v261_v4 = vmul.f32 0.03125, %v257_v27 }
 0x310   :  { %v263_v28 = vadd.f32 1e-12, %v261_v4 }
 0x311   :  { %v260_v29 = vpop.xlane.xlu1 %259 }
 0x312   :  { %363 = vrsqrt.f32 %v263_v28  ;;  %v262_v30 = vmul.f32 0.03125, %v260_v29 }
 0x314   :  { %v264_v31 = vadd.f32 1e-12, %v262_v30 }
 0x316   :  { %365 = vrsqrt.f32 %v264_v31 }
 0x31c   :  { %v364_v32 = vpop.eup %363 }
 0x31d   :  { %v267_v34 = vmul.f32 %v364_v32, %v251_v20 }
 0x31f   :  { %v275_v36 = vmul.f32 %v313_v33, %v267_v34 }
 0x320   :  { %v366_v37 = vpop.eup %365 }
 0x321   :  { %v268_v38 = vmul.f32 %v366_v37, %v252_v24  ;;  %v283_v39 = vadd.f32 %v314_v35, %v275_v36 }
 0x323   :  { %v276_v40 = vmul.f32 %v313_v33, %v268_v38  ;;  %285 = vst.msk [vmem:[#allocation2] sm:$0xff] %vm54_vm1, %v283_v39 }
 0x325   :  { %v284_v41 = vadd.f32 %v314_v35, %v276_v40 }
 0x327   :  { %286 = vst.msk [vmem:[#allocation2 + $0x8] sm:$0xff] %vm54_vm1, %v284_v41 }
 0x328   :  { %378 = shalt.err (!%p375_p4)
}
 0x329   :  { %s379_s23 = scalar_lea.hbm %s507_s7, 256 }
 0x32a   :  { %p380_p5 = scmp.ne.s32.totalorder %s507_s7, %s379_s23  ;;  %p383_p6 = scmp.lt.u32.totalorder %s379_s23, %s507_s7 }
 0x32c   :  { %p385_p7 = pnand %p383_p6, %p380_p5 }
 0x32e   :  { %388 = shalt.err (!%p385_p7)
}
 0x32f   :  { %s395_s28 = smov 128   ;;  %s396_s29 = smov 8  }
 0x330   :  { %298 = dma.vmem_to_hbm [thread:$0]  %s293_s21, 256, %s507_s7, [#allocation3], %s395_s28, %s395_s28, %s396_s29  }
 0x331   :  { %389 = dma.done.wait [#allocation3], 256  }
 0x332   :  { %390 = vsyncadd [#allocation3], 4294967040 }
 0x333   :  { %302 = vsyncpa [#allocation3], 1 }

// kernel: transformer_layer_forward.19
= control target key start
LH: loop header
LB: loop body
LE: loop exit
PB: predicated region body
PF: predicated region fallthrough
CT: control target
= control target key end

     0   :  { %v124_v0 = vmov 0.0   ;;  %vm125_vm0 = vmmov 0   ;;  %vm41_vm1 = vcmask 261120   ;;  %vm94_vm2 = vcmask 257024   ;;  %s167_s1 = inlined_call_operand.vmem [shape: bf16[32,32], index: 1, kind: input, shape index: {}]   ;;  %s168_s0 = inlined_call_operand.vmem [shape: f32[16,32], index: 0, kind: input, shape index: {}]   ;;  %s169_s2 = inlined_call_operand.vmem [shape: f32[1,32], index: 2, kind: input, shape index: {}]   ;;  %s170_s3 = inlined_call_operand.vmem [shape: bf16[16,32], index: 3, kind: output, shape index: {}]  }
   0x1   :  { %112 = vmatprep.subr.bf16.mxu0 %v124_v0  ;;  %v122_v1 = vld [vmem:[%s167_s1] sm:$0xff]   ;;  %116 = vmatprep.mubr.msk.bf16.mxu0 %vm125_vm0, %v124_v0  ;;  %v123_v2 = vld [vmem:[%s167_s1 + $0x8] sm:$0xff]  }
   0x2   :  { %113 = vmatpush3.bf16.msra.mxu0 %v122_v1  ;;  %v15_v3 = vld [vmem:[%s168_s0] sm:$0xff]  ;;  %v16_v4 = vld [vmem:[%s168_s0 + $0x8] sm:$0xff] }
   0x3   :  { %114 = vmatprep.subr.bf16.mxu0 %v124_v0  ;;  %v17_v5 = vpack.c.bf16 %v16_v4, %v15_v3  ;;  %v101_v6 = vld [vmem:[%s169_s2] ss:$0 sm:$0xff] }
   0x6   :  { %115 = vmatpush3.bf16.msra.mxu0 %v123_v2 }
   0x9   :  { %117 = vmatmul.mubr.msk.bf16.vlgmr.msra.gmra.mrb[0].mxu0 %vm41_vm1, %v17_v5 }
  0xdc   :  { %v79_v7 = vpop.f32.mrb[0].mxu0 }
  0xdd   :  { %v80_v8 = vadd.f32 %v101_v6, %v79_v7  ;;  %v118_v9 = vpop.f32.mrb[1].mxu0 }
  0xde   :  { %v82_v10 = vpop.f32.mrb[2].mxu0 }
  0xdf   :  { %v107_v11 = vpack.c.bf16 %v80_v8, %v80_v8  ;;  %v83_v12 = vadd.f32 %v101_v6, %v82_v10  ;;  %v119_v13 = vpop.f32.mrb[3].mxu0 }
  0xe1   :  { %95 = vst.msk [vmem:[%s170_s3] sm:$0xf] %vm94_vm2, %v107_v11  ;;  %v108_v14 = vpack.c.bf16 %v83_v12, %v83_v12 }
  0xe3   :  { %96 = vst.msk [vmem:[%s170_s3 + $0x4] sm:$0xf] %vm94_vm2, %v108_v14 }

</bundles_post_ra>
